<compile_context>
chip_gen: v7x
topology: tpu7x:2x2x1
jax: 0.10.0
libtpu: 0.0.40
codegen_flags: <defaults>
</compile_context>

<pallas_src>
import numpy as np
import jax
import jax.numpy as jnp
from jax.experimental import pallas as pl
from jax.experimental.pallas import tpu as pltpu

_BN_EPS = 1e-5


# --------------------------- host-side matrix prep --------------------------

def _build_row_conv_weight(w_oihw, W):
    """Fold a 3x3 'same' conv into 3 block-Toeplitz row-matmul weights.

    Returns wk of shape (3, W*Cin, W*Cout) in bf16 such that, for an H-padded
    row buffer X (one row per padded image row, lane layout w*Cin + ci),
        conv_rows = sum_kh X[kh : kh + rows - 2, :] @ wk[kh]
    equals the conv output rows with lane layout w*Cout + co.  The kw shifts
    and the zero padding along W are baked into the matrix structure.
    """
    Cout, Cin, KH, KW = w_oihw.shape
    wt = jnp.transpose(w_oihw, (2, 3, 1, 0)).astype(jnp.float32)  # (KH,KW,Cin,Cout)
    per_kh = []
    for kh in range(KH):
        t = jnp.zeros((W, Cin, W, Cout), jnp.float32)
        for kw in range(KW):
            lo = max(0, 1 - kw)           # keep 0 <= w + kw - 1 < W (zero pad)
            hi = min(W, W + 1 - kw)
            ws = jnp.arange(lo, hi)
            t = t.at[ws + (kw - 1), :, ws, :].set(
                jnp.broadcast_to(wt[kh, kw], (hi - lo, Cin, Cout)))
        per_kh.append(t.reshape(W * Cin, W * Cout))
    return jnp.stack(per_kh).astype(jnp.bfloat16)


def _lane_channel_maps(W, C):
    """S: (W*C, C) sums lane w*C+c into channel c;  ST = S.T broadcasts back."""
    s = np.tile(np.eye(C, dtype=np.float32), (W, 1))
    return jnp.asarray(s), jnp.asarray(s.T)


def _pool_select(W, C, H):
    """0/1 selection matrices implementing 2x2 stride-2 max-pool via matmuls."""
    Wo, Ho = W // 2, H // 2
    pe = np.zeros((W * C, Wo * C), np.float32)
    po = np.zeros((W * C, Wo * C), np.float32)
    for j in range(Wo):
        for c in range(C):
            pe[(2 * j) * C + c, j * C + c] = 1.0
            po[(2 * j + 1) * C + c, j * C + c] = 1.0
    re = np.zeros((Ho, H), np.float32)
    ro = np.zeros((Ho, H), np.float32)
    for i in range(Ho):
        re[i, 2 * i] = 1.0
        ro[i, 2 * i + 1] = 1.0
    return jnp.asarray(pe), jnp.asarray(po), jnp.asarray(re), jnp.asarray(ro)


# ------------------------------ fused kernel --------------------------------

def _make_fused_kernel(N, H, W, Cin, Cmid, Cout, pooling):
    Hp = H + 2
    Ho, Wo = H // 2, W // 2
    nrows = N * Hp - 2                    # conv output rows (incl. batch-seam junk)
    inv_count = 1.0 / float(N * H * W)

    def _conv_rows(rows_ref, wk_ref):
        """rows_ref: (N*Hp, W*Ci) f32 H-padded rows; wk_ref: (3, W*Ci, W*Co) bf16."""
        acc = None
        for kh in range(3):
            lhs = rows_ref[kh:kh + nrows, :].astype(jnp.bfloat16)
            part = jnp.dot(lhs, wk_ref[kh], preferred_element_type=jnp.float32)
            acc = part if acc is None else acc + part
        return acc                        # (nrows, W*Co) float32

    def _bn_scale_shift(v, s_ref, st_ref, g_ref, be_ref):
        """Training-mode BN folded into per-lane scale/shift (valid rows of v only)."""
        colsum = colsq = None
        for n in range(N):
            blk = v[n * Hp:n * Hp + H, :]
            cs = jnp.sum(blk, axis=0, keepdims=True)
            cq = jnp.sum(blk * blk, axis=0, keepdims=True)
            colsum = cs if colsum is None else colsum + cs
            colsq = cq if colsq is None else colsq + cq
        mean = jnp.dot(colsum, s_ref[...], preferred_element_type=jnp.float32) * inv_count
        msq = jnp.dot(colsq, s_ref[...], preferred_element_type=jnp.float32) * inv_count
        var = msq - mean * mean                               # biased variance
        scale_c = g_ref[...] * jax.lax.rsqrt(var + _BN_EPS)   # (1, C)
        shift_c = be_ref[...] - mean * scale_c                # (1, C)
        scale_l = jnp.dot(scale_c, st_ref[...], preferred_element_type=jnp.float32)
        shift_l = jnp.dot(shift_c, st_ref[...], preferred_element_type=jnp.float32)
        return scale_l, shift_l                               # (1, W*C) each

    def _body(x_ref, wk1_ref, s1_ref, st1_ref, g1_ref, be1_ref,
              wk2_ref, s2_ref, st2_ref, g2_ref, be2_ref,
              pool_refs, o_ref, rows2_ref):
        # ---- conv1 on the H-padded input rows (already in VMEM) ------------
        v1 = _conv_rows(x_ref, wk1_ref)                       # (nrows, W*Cmid)

        # ---- BN1 + ReLU -> H-padded conv2 input rows in VMEM scratch -------
        sc1, sh1 = _bn_scale_shift(v1, s1_ref, st1_ref, g1_ref, be1_ref)
        rows2_ref[...] = jnp.zeros(rows2_ref.shape, rows2_ref.dtype)
        for n in range(N):
            a1 = jnp.maximum(v1[n * Hp:n * Hp + H, :] * sc1 + sh1, 0.0)
            rows2_ref[n * Hp + 1:n * Hp + 1 + H, :] = a1

        # ---- conv2 + BN2 + ReLU (+ optional 2x2/2 max-pool) ----------------
        v2 = _conv_rows(rows2_ref, wk2_ref)                   # (nrows, W*Cout)
        sc2, sh2 = _bn_scale_shift(v2, s2_ref, st2_ref, g2_ref, be2_ref)
        for n in range(N):
            a2 = jnp.maximum(v2[n * Hp:n * Hp + H, :] * sc2 + sh2, 0.0)
            if pooling:
                pe_ref, po_ref, re_ref, ro_ref = pool_refs
                cmax = jnp.maximum(
                    jnp.dot(a2, pe_ref[...], preferred_element_type=jnp.float32),
                    jnp.dot(a2, po_ref[...], preferred_element_type=jnp.float32))
                pmax = jnp.maximum(
                    jnp.dot(re_ref[...], cmax, preferred_element_type=jnp.float32),
                    jnp.dot(ro_ref[...], cmax, preferred_element_type=jnp.float32))
                o_ref[n * Ho:(n + 1) * Ho, :] = pmax
            else:
                o_ref[n * H:(n + 1) * H, :] = a2

    if pooling:
        def kernel(x_ref, wk1_ref, s1_ref, st1_ref, g1_ref, be1_ref,
                   wk2_ref, s2_ref, st2_ref, g2_ref, be2_ref,
                   pe_ref, po_ref, re_ref, ro_ref, o_ref, rows2_ref):
            _body(x_ref, wk1_ref, s1_ref, st1_ref, g1_ref, be1_ref,
                  wk2_ref, s2_ref, st2_ref, g2_ref, be2_ref,
                  (pe_ref, po_ref, re_ref, ro_ref), o_ref, rows2_ref)
    else:
        def kernel(x_ref, wk1_ref, s1_ref, st1_ref, g1_ref, be1_ref,
                   wk2_ref, s2_ref, st2_ref, g2_ref, be2_ref,
                   o_ref, rows2_ref):
            _body(x_ref, wk1_ref, s1_ref, st1_ref, g1_ref, be1_ref,
                  wk2_ref, s2_ref, st2_ref, g2_ref, be2_ref,
                  None, o_ref, rows2_ref)
    return kernel


# --------------------------------- wrapper ----------------------------------

def conv_block_forward(x_nchw, params, pooling=False):
    """Pallas TPU forward for Conv_Block; takes/returns PyTorch-style NCHW."""
    N, Cin, H, W = x_nchw.shape
    Cmid = params["w1"].shape[0]
    Cout = params["w2"].shape[0]
    Hp = H + 2
    Ho, Wo = H // 2, W // 2

    # NCHW -> H-padded NHWC rows: (N*(H+2), W*Cin), lane layout = w*Cin + ci.
    x_nhwc = jnp.transpose(x_nchw, (0, 2, 3, 1)).astype(jnp.float32)
    x_rows = jnp.pad(x_nhwc, ((0, 0), (1, 1), (0, 0), (0, 0))).reshape(N * Hp, W * Cin)

    # Conv weights as block-Toeplitz row matmuls (bf16 operands for the MXU).
    # Conv biases b1/b2 are dropped: training-mode BN cancels them exactly.
    wk1 = _build_row_conv_weight(params["w1"], W)
    wk2 = _build_row_conv_weight(params["w2"], W)
    s1, st1 = _lane_channel_maps(W, Cmid)
    s2, st2 = _lane_channel_maps(W, Cout)
    g1 = params["g1"].reshape(1, Cmid).astype(jnp.float32)
    be1 = params["be1"].reshape(1, Cmid).astype(jnp.float32)
    g2 = params["g2"].reshape(1, Cout).astype(jnp.float32)
    be2 = params["be2"].reshape(1, Cout).astype(jnp.float32)

    inputs = [x_rows, wk1, s1, st1, g1, be1, wk2, s2, st2, g2, be2]
    if pooling:
        assert H % 2 == 0 and W % 2 == 0
        inputs += list(_pool_select(W, Cout, H))
        out_shape = jax.ShapeDtypeStruct((N * Ho, Wo * Cout), jnp.float32)
    else:
        out_shape = jax.ShapeDtypeStruct((N * H, W * Cout), jnp.float32)

    kernel = _make_fused_kernel(N, H, W, Cin, Cmid, Cout, pooling)
    out2d = pl.pallas_call(
        kernel,
        out_shape=out_shape,
        scratch_shapes=[pltpu.VMEM((N * Hp, W * Cmid), jnp.float32)],
        compiler_params=pltpu.CompilerParams(vmem_limit_bytes=32 * 1024 * 1024),
    )(*inputs)

    if pooling:
        out_nhwc = out2d.reshape(N, Ho, Wo, Cout)
    else:
        out_nhwc = out2d.reshape(N, H, W, Cout)
    return jnp.transpose(out_nhwc, (0, 3, 1, 2))  # NHWC -> NCHW


# --------------------------- pure-JAX reference ------------------------------

def reference_forward(x_nchw, params, pooling=False):
    def conv(x, w, b):
        y = jax.lax.conv_general_dilated(
            x, w, (1, 1), ((1, 1), (1, 1)),
            dimension_numbers=("NCHW", "OIHW", "NCHW"))
        return y + b.reshape(1, -1, 1, 1)

    def bnrelu(y, g, be):
        mean = jnp.mean(y, axis=(0, 2, 3), keepdims=True)
        var = jnp.mean((y - mean) ** 2, axis=(0, 2, 3), keepdims=True)
        yh = (y - mean) * jax.lax.rsqrt(var + _BN_EPS)
        return jnp.maximum(yh * g.reshape(1, -1, 1, 1) + be.reshape(1, -1, 1, 1), 0.0)

    y = bnrelu(conv(x_nchw, params["w1"], params["b1"]), params["g1"], params["be1"])
    y = bnrelu(conv(y, params["w2"], params["b2"]), params["g2"], params["be2"])
    if pooling:
        y = jax.lax.reduce_window(y, -jnp.inf, jax.lax.max,
                                  (1, 1, 2, 2), (1, 1, 2, 2), "VALID")
    return y


# ----------------------------------- main ------------------------------------

if __name__ == "__main__":
    key = jax.random.PRNGKey(0)
    ks = jax.random.split(key, 10)
    in_c, mid_c, out_c = 4, 8, 8
    N, H, W = 2, 16, 16

    params = {
        "w1": 0.1 * jax.random.normal(ks[0], (mid_c, in_c, 3, 3), jnp.float32),
        "b1": 0.1 * jax.random.normal(ks[1], (mid_c,), jnp.float32),
        "g1": 1.0 + 0.1 * jax.random.normal(ks[2], (mid_c,), jnp.float32),
        "be1": 0.1 * jax.random.normal(ks[3], (mid_c,), jnp.float32),
        "w2": 0.1 * jax.random.normal(ks[4], (out_c, mid_c, 3, 3), jnp.float32),
        "b2": 0.1 * jax.random.normal(ks[5], (out_c,), jnp.float32),
        "g2": 1.0 + 0.1 * jax.random.normal(ks[6], (out_c,), jnp.float32),
        "be2": 0.1 * jax.random.normal(ks[7], (out_c,), jnp.float32),
    }
    x = jax.random.normal(ks[8], (N, in_c, H, W), jnp.float32)

    for pooling in (True, False):
        out = jax.block_until_ready(conv_block_forward(x, params, pooling=pooling))
        ref = jax.block_until_ready(reference_forward(x, params, pooling=pooling))
        assert out.shape == ref.shape, (out.shape, ref.shape)
        assert np.all(np.isfinite(np.asarray(out)))
        assert np.allclose(np.asarray(out), np.asarray(ref), rtol=2e-2, atol=2e-2), (
            float(np.max(np.abs(np.asarray(out) - np.asarray(ref)))))
    print("KERNEL_OK")
</pallas_src>

<mosaic_0001>
module attributes {stable_mosaic.version = 11 : i64} {
  func.func @kernel(%arg0: memref<36x64xf32, #tpu.memory_space<vmem>>, %arg1: memref<3x64x128xbf16, #tpu.memory_space<vmem>>, %arg2: memref<128x8xf32, #tpu.memory_space<vmem>>, %arg3: memref<8x128xf32, #tpu.memory_space<vmem>>, %arg4: memref<1x8xf32, #tpu.memory_space<vmem>>, %arg5: memref<1x8xf32, #tpu.memory_space<vmem>>, %arg6: memref<3x128x128xbf16, #tpu.memory_space<vmem>>, %arg7: memref<128x8xf32, #tpu.memory_space<vmem>>, %arg8: memref<8x128xf32, #tpu.memory_space<vmem>>, %arg9: memref<1x8xf32, #tpu.memory_space<vmem>>, %arg10: memref<1x8xf32, #tpu.memory_space<vmem>>, %arg11: memref<128x64xf32, #tpu.memory_space<vmem>>, %arg12: memref<128x64xf32, #tpu.memory_space<vmem>>, %arg13: memref<8x16xf32, #tpu.memory_space<vmem>>, %arg14: memref<8x16xf32, #tpu.memory_space<vmem>>, %arg15: memref<16x64xf32, #tpu.memory_space<vmem>>, %arg16: memref<36x128xf32, #tpu.memory_space<vmem>>) attributes {dimension_semantics = [], scalar_prefetch = 0 : i64, scratch_operands = 1 : i64, tpu.core_type = #tpu.core_type<tc>} {
    %c0 = arith.constant 0 : index
    %c0_0 = arith.constant 0 : index
    %0 = vector.load %arg0[%c0, %c0_0] : memref<36x64xf32, #tpu.memory_space<vmem>>, vector<34x64xf32>
    %1 = arith.truncf %0 : vector<34x64xf32> to vector<34x64xbf16>
    %c0_1 = arith.constant 0 : index
    %c0_2 = arith.constant 0 : index
    %c0_3 = arith.constant 0 : index
    %2 = vector.load %arg1[%c0_1, %c0_2, %c0_3] : memref<3x64x128xbf16, #tpu.memory_space<vmem>>, vector<1x64x128xbf16>
    %3 = vector.shape_cast %2 : vector<1x64x128xbf16> to vector<64x128xbf16>
    %cst = arith.constant dense<0.000000e+00> : vector<34x128xf32>
    %4 = tpu.matmul %1, %3, %cst {dimension_numbers = #tpu.dot_dimension_numbers<[1], [0], [0], [1], [0, 0, 1, 1], [], []>} : vector<34x64xbf16>, vector<64x128xbf16>, vector<34x128xf32> -> vector<34x128xf32>
    %c1 = arith.constant 1 : index
    %c0_4 = arith.constant 0 : index
    %5 = vector.load %arg0[%c1, %c0_4] : memref<36x64xf32, #tpu.memory_space<vmem>>, vector<34x64xf32>
    %6 = arith.truncf %5 : vector<34x64xf32> to vector<34x64xbf16>
    %c1_5 = arith.constant 1 : index
    %c0_6 = arith.constant 0 : index
    %c0_7 = arith.constant 0 : index
    %7 = vector.load %arg1[%c1_5, %c0_6, %c0_7] : memref<3x64x128xbf16, #tpu.memory_space<vmem>>, vector<1x64x128xbf16>
    %8 = vector.shape_cast %7 : vector<1x64x128xbf16> to vector<64x128xbf16>
    %cst_8 = arith.constant dense<0.000000e+00> : vector<34x128xf32>
    %9 = tpu.matmul %6, %8, %cst_8 {dimension_numbers = #tpu.dot_dimension_numbers<[1], [0], [0], [1], [0, 0, 1, 1], [], []>} : vector<34x64xbf16>, vector<64x128xbf16>, vector<34x128xf32> -> vector<34x128xf32>
    %10 = arith.addf %4, %9 : vector<34x128xf32>
    %c2 = arith.constant 2 : index
    %c0_9 = arith.constant 0 : index
    %11 = vector.load %arg0[%c2, %c0_9] : memref<36x64xf32, #tpu.memory_space<vmem>>, vector<34x64xf32>
    %12 = arith.truncf %11 : vector<34x64xf32> to vector<34x64xbf16>
    %c2_10 = arith.constant 2 : index
    %c0_11 = arith.constant 0 : index
    %c0_12 = arith.constant 0 : index
    %13 = vector.load %arg1[%c2_10, %c0_11, %c0_12] : memref<3x64x128xbf16, #tpu.memory_space<vmem>>, vector<1x64x128xbf16>
    %14 = vector.shape_cast %13 : vector<1x64x128xbf16> to vector<64x128xbf16>
    %cst_13 = arith.constant dense<0.000000e+00> : vector<34x128xf32>
    %15 = tpu.matmul %12, %14, %cst_13 {dimension_numbers = #tpu.dot_dimension_numbers<[1], [0], [0], [1], [0, 0, 1, 1], [], []>} : vector<34x64xbf16>, vector<64x128xbf16>, vector<34x128xf32> -> vector<34x128xf32>
    %16 = arith.addf %10, %15 : vector<34x128xf32>
    %17 = vector.extract_strided_slice %16 {offsets = [0, 0], sizes = [16, 128], strides = [1, 1]} : vector<34x128xf32> to vector<16x128xf32>
    %cst_14 = arith.constant dense<0.000000e+00> : vector<128xf32>
    %18 = vector.multi_reduction <add>, %17, %cst_14 [0] : vector<16x128xf32> to vector<128xf32>
    %19 = vector.shape_cast %18 : vector<128xf32> to vector<1x128xf32>
    %20 = arith.mulf %17, %17 : vector<16x128xf32>
    %cst_15 = arith.constant dense<0.000000e+00> : vector<128xf32>
    %21 = vector.multi_reduction <add>, %20, %cst_15 [0] : vector<16x128xf32> to vector<128xf32>
    %22 = vector.shape_cast %21 : vector<128xf32> to vector<1x128xf32>
    %23 = vector.extract_strided_slice %16 {offsets = [18, 0], sizes = [16, 128], strides = [1, 1]} : vector<34x128xf32> to vector<16x128xf32>
    %cst_16 = arith.constant dense<0.000000e+00> : vector<128xf32>
    %24 = vector.multi_reduction <add>, %23, %cst_16 [0] : vector<16x128xf32> to vector<128xf32>
    %25 = vector.shape_cast %24 : vector<128xf32> to vector<1x128xf32>
    %26 = arith.mulf %23, %23 : vector<16x128xf32>
    %cst_17 = arith.constant dense<0.000000e+00> : vector<128xf32>
    %27 = vector.multi_reduction <add>, %26, %cst_17 [0] : vector<16x128xf32> to vector<128xf32>
    %28 = vector.shape_cast %27 : vector<128xf32> to vector<1x128xf32>
    %29 = arith.addf %19, %25 : vector<1x128xf32>
    %30 = arith.addf %22, %28 : vector<1x128xf32>
    %c0_18 = arith.constant 0 : index
    %c0_19 = arith.constant 0 : index
    %31 = vector.load %arg2[%c0_18, %c0_19] : memref<128x8xf32, #tpu.memory_space<vmem>>, vector<128x8xf32>
    %cst_20 = arith.constant dense<0.000000e+00> : vector<1x8xf32>
    %32 = tpu.matmul %29, %31, %cst_20 {dimension_numbers = #tpu.dot_dimension_numbers<[1], [0], [0], [1], [0, 0, 1, 1], [], []>} : vector<1x128xf32>, vector<128x8xf32>, vector<1x8xf32> -> vector<1x8xf32>
    %cst_21 = arith.constant 0.001953125 : f32
    %33 = vector.broadcast %cst_21 : f32 to vector<1x8xf32>
    %34 = arith.mulf %32, %33 : vector<1x8xf32>
    %c0_22 = arith.constant 0 : index
    %c0_23 = arith.constant 0 : index
    %35 = vector.load %arg2[%c0_22, %c0_23] : memref<128x8xf32, #tpu.memory_space<vmem>>, vector<128x8xf32>
    %cst_24 = arith.constant dense<0.000000e+00> : vector<1x8xf32>
    %36 = tpu.matmul %30, %35, %cst_24 {dimension_numbers = #tpu.dot_dimension_numbers<[1], [0], [0], [1], [0, 0, 1, 1], [], []>} : vector<1x128xf32>, vector<128x8xf32>, vector<1x8xf32> -> vector<1x8xf32>
    %cst_25 = arith.constant 0.001953125 : f32
    %37 = vector.broadcast %cst_25 : f32 to vector<1x8xf32>
    %38 = arith.mulf %36, %37 : vector<1x8xf32>
    %39 = arith.mulf %34, %34 : vector<1x8xf32>
    %40 = arith.subf %38, %39 : vector<1x8xf32>
    %c0_26 = arith.constant 0 : index
    %c0_27 = arith.constant 0 : index
    %41 = vector.load %arg4[%c0_26, %c0_27] : memref<1x8xf32, #tpu.memory_space<vmem>>, vector<1x8xf32>
    %cst_28 = arith.constant 9.99999974E-6 : f32
    %42 = vector.broadcast %cst_28 : f32 to vector<1x8xf32>
    %43 = arith.addf %40, %42 : vector<1x8xf32>
    %44 = math.rsqrt %43 : vector<1x8xf32>
    %45 = arith.mulf %41, %44 : vector<1x8xf32>
    %c0_29 = arith.constant 0 : index
    %c0_30 = arith.constant 0 : index
    %46 = vector.load %arg5[%c0_29, %c0_30] : memref<1x8xf32, #tpu.memory_space<vmem>>, vector<1x8xf32>
    %47 = arith.mulf %34, %45 : vector<1x8xf32>
    %48 = arith.subf %46, %47 : vector<1x8xf32>
    %c0_31 = arith.constant 0 : index
    %c0_32 = arith.constant 0 : index
    %49 = vector.load %arg3[%c0_31, %c0_32] : memref<8x128xf32, #tpu.memory_space<vmem>>, vector<8x128xf32>
    %cst_33 = arith.constant dense<0.000000e+00> : vector<1x128xf32>
    %50 = tpu.matmul %45, %49, %cst_33 {dimension_numbers = #tpu.dot_dimension_numbers<[1], [0], [0], [1], [0, 0, 1, 1], [], []>} : vector<1x8xf32>, vector<8x128xf32>, vector<1x128xf32> -> vector<1x128xf32>
    %c0_34 = arith.constant 0 : index
    %c0_35 = arith.constant 0 : index
    %51 = vector.load %arg3[%c0_34, %c0_35] : memref<8x128xf32, #tpu.memory_space<vmem>>, vector<8x128xf32>
    %cst_36 = arith.constant dense<0.000000e+00> : vector<1x128xf32>
    %52 = tpu.matmul %48, %51, %cst_36 {dimension_numbers = #tpu.dot_dimension_numbers<[1], [0], [0], [1], [0, 0, 1, 1], [], []>} : vector<1x8xf32>, vector<8x128xf32>, vector<1x128xf32> -> vector<1x128xf32>
    %cst_37 = arith.constant 0.000000e+00 : f32
    %53 = vector.broadcast %cst_37 : f32 to vector<36x128xf32>
    %c0_38 = arith.constant 0 : index
    %c0_39 = arith.constant 0 : index
    %54 = vector.load %arg16[%c0_38, %c0_39] : memref<36x128xf32, #tpu.memory_space<vmem>>, vector<36x128xf32>
    tpu.vector_store %arg16[%c0_38, %c0_39], %53 {strides = array<i32>} : memref<36x128xf32, #tpu.memory_space<vmem>>, vector<36x128xf32>,
    %55 = vector.extract_strided_slice %16 {offsets = [0, 0], sizes = [16, 128], strides = [1, 1]} : vector<34x128xf32> to vector<16x128xf32>
    %56 = vector.broadcast %50 : vector<1x128xf32> to vector<16x128xf32>
    %57 = arith.mulf %55, %56 : vector<16x128xf32>
    %58 = vector.broadcast %52 : vector<1x128xf32> to vector<16x128xf32>
    %59 = arith.addf %57, %58 : vector<16x128xf32>
    %cst_40 = arith.constant 0.000000e+00 : f32
    %60 = vector.broadcast %cst_40 : f32 to vector<16x128xf32>
    %61 = arith.maximumf %59, %60 : vector<16x128xf32>
    %c1_41 = arith.constant 1 : index
    %c0_42 = arith.constant 0 : index
    %62 = vector.load %arg16[%c1_41, %c0_42] : memref<36x128xf32, #tpu.memory_space<vmem>>, vector<16x128xf32>
    tpu.vector_store %arg16[%c1_41, %c0_42], %61 {strides = array<i32>} : memref<36x128xf32, #tpu.memory_space<vmem>>, vector<16x128xf32>,
    %63 = vector.extract_strided_slice %16 {offsets = [18, 0], sizes = [16, 128], strides = [1, 1]} : vector<34x128xf32> to vector<16x128xf32>
    %64 = vector.broadcast %50 : vector<1x128xf32> to vector<16x128xf32>
    %65 = arith.mulf %63, %64 : vector<16x128xf32>
    %66 = vector.broadcast %52 : vector<1x128xf32> to vector<16x128xf32>
    %67 = arith.addf %65, %66 : vector<16x128xf32>
    %cst_43 = arith.constant 0.000000e+00 : f32
    %68 = vector.broadcast %cst_43 : f32 to vector<16x128xf32>
    %69 = arith.maximumf %67, %68 : vector<16x128xf32>
    %c19 = arith.constant 19 : index
    %c0_44 = arith.constant 0 : index
    %70 = vector.load %arg16[%c19, %c0_44] : memref<36x128xf32, #tpu.memory_space<vmem>>, vector<16x128xf32>
    tpu.vector_store %arg16[%c19, %c0_44], %69 {strides = array<i32>} : memref<36x128xf32, #tpu.memory_space<vmem>>, vector<16x128xf32>,
    %c0_45 = arith.constant 0 : index
    %c0_46 = arith.constant 0 : index
    %71 = vector.load %arg16[%c0_45, %c0_46] : memref<36x128xf32, #tpu.memory_space<vmem>>, vector<34x128xf32>
    %72 = arith.truncf %71 : vector<34x128xf32> to vector<34x128xbf16>
    %c0_47 = arith.constant 0 : index
    %c0_48 = arith.constant 0 : index
    %c0_49 = arith.constant 0 : index
    %73 = vector.load %arg6[%c0_47, %c0_48, %c0_49] : memref<3x128x128xbf16, #tpu.memory_space<vmem>>, vector<1x128x128xbf16>
    %74 = vector.shape_cast %73 : vector<1x128x128xbf16> to vector<128x128xbf16>
    %cst_50 = arith.constant dense<0.000000e+00> : vector<34x128xf32>
    %75 = tpu.matmul %72, %74, %cst_50 {dimension_numbers = #tpu.dot_dimension_numbers<[1], [0], [0], [1], [0, 0, 1, 1], [], []>} : vector<34x128xbf16>, vector<128x128xbf16>, vector<34x128xf32> -> vector<34x128xf32>
    %c1_51 = arith.constant 1 : index
    %c0_52 = arith.constant 0 : index
    %76 = vector.load %arg16[%c1_51, %c0_52] : memref<36x128xf32, #tpu.memory_space<vmem>>, vector<34x128xf32>
    %77 = arith.truncf %76 : vector<34x128xf32> to vector<34x128xbf16>
    %c1_53 = arith.constant 1 : index
    %c0_54 = arith.constant 0 : index
    %c0_55 = arith.constant 0 : index
    %78 = vector.load %arg6[%c1_53, %c0_54, %c0_55] : memref<3x128x128xbf16, #tpu.memory_space<vmem>>, vector<1x128x128xbf16>
    %79 = vector.shape_cast %78 : vector<1x128x128xbf16> to vector<128x128xbf16>
    %cst_56 = arith.constant dense<0.000000e+00> : vector<34x128xf32>
    %80 = tpu.matmul %77, %79, %cst_56 {dimension_numbers = #tpu.dot_dimension_numbers<[1], [0], [0], [1], [0, 0, 1, 1], [], []>} : vector<34x128xbf16>, vector<128x128xbf16>, vector<34x128xf32> -> vector<34x128xf32>
    %81 = arith.addf %75, %80 : vector<34x128xf32>
    %c2_57 = arith.constant 2 : index
    %c0_58 = arith.constant 0 : index
    %82 = vector.load %arg16[%c2_57, %c0_58] : memref<36x128xf32, #tpu.memory_space<vmem>>, vector<34x128xf32>
    %83 = arith.truncf %82 : vector<34x128xf32> to vector<34x128xbf16>
    %c2_59 = arith.constant 2 : index
    %c0_60 = arith.constant 0 : index
    %c0_61 = arith.constant 0 : index
    %84 = vector.load %arg6[%c2_59, %c0_60, %c0_61] : memref<3x128x128xbf16, #tpu.memory_space<vmem>>, vector<1x128x128xbf16>
    %85 = vector.shape_cast %84 : vector<1x128x128xbf16> to vector<128x128xbf16>
    %cst_62 = arith.constant dense<0.000000e+00> : vector<34x128xf32>
    %86 = tpu.matmul %83, %85, %cst_62 {dimension_numbers = #tpu.dot_dimension_numbers<[1], [0], [0], [1], [0, 0, 1, 1], [], []>} : vector<34x128xbf16>, vector<128x128xbf16>, vector<34x128xf32> -> vector<34x128xf32>
    %87 = arith.addf %81, %86 : vector<34x128xf32>
    %88 = vector.extract_strided_slice %87 {offsets = [0, 0], sizes = [16, 128], strides = [1, 1]} : vector<34x128xf32> to vector<16x128xf32>
    %cst_63 = arith.constant dense<0.000000e+00> : vector<128xf32>
    %89 = vector.multi_reduction <add>, %88, %cst_63 [0] : vector<16x128xf32> to vector<128xf32>
    %90 = vector.shape_cast %89 : vector<128xf32> to vector<1x128xf32>
    %91 = arith.mulf %88, %88 : vector<16x128xf32>
    %cst_64 = arith.constant dense<0.000000e+00> : vector<128xf32>
    %92 = vector.multi_reduction <add>, %91, %cst_64 [0] : vector<16x128xf32> to vector<128xf32>
    %93 = vector.shape_cast %92 : vector<128xf32> to vector<1x128xf32>
    %94 = vector.extract_strided_slice %87 {offsets = [18, 0], sizes = [16, 128], strides = [1, 1]} : vector<34x128xf32> to vector<16x128xf32>
    %cst_65 = arith.constant dense<0.000000e+00> : vector<128xf32>
    %95 = vector.multi_reduction <add>, %94, %cst_65 [0] : vector<16x128xf32> to vector<128xf32>
    %96 = vector.shape_cast %95 : vector<128xf32> to vector<1x128xf32>
    %97 = arith.mulf %94, %94 : vector<16x128xf32>
    %cst_66 = arith.constant dense<0.000000e+00> : vector<128xf32>
    %98 = vector.multi_reduction <add>, %97, %cst_66 [0] : vector<16x128xf32> to vector<128xf32>
    %99 = vector.shape_cast %98 : vector<128xf32> to vector<1x128xf32>
    %100 = arith.addf %90, %96 : vector<1x128xf32>
    %101 = arith.addf %93, %99 : vector<1x128xf32>
    %c0_67 = arith.constant 0 : index
    %c0_68 = arith.constant 0 : index
    %102 = vector.load %arg7[%c0_67, %c0_68] : memref<128x8xf32, #tpu.memory_space<vmem>>, vector<128x8xf32>
    %cst_69 = arith.constant dense<0.000000e+00> : vector<1x8xf32>
    %103 = tpu.matmul %100, %102, %cst_69 {dimension_numbers = #tpu.dot_dimension_numbers<[1], [0], [0], [1], [0, 0, 1, 1], [], []>} : vector<1x128xf32>, vector<128x8xf32>, vector<1x8xf32> -> vector<1x8xf32>
    %cst_70 = arith.constant 0.001953125 : f32
    %104 = vector.broadcast %cst_70 : f32 to vector<1x8xf32>
    %105 = arith.mulf %103, %104 : vector<1x8xf32>
    %c0_71 = arith.constant 0 : index
    %c0_72 = arith.constant 0 : index
    %106 = vector.load %arg7[%c0_71, %c0_72] : memref<128x8xf32, #tpu.memory_space<vmem>>, vector<128x8xf32>
    %cst_73 = arith.constant dense<0.000000e+00> : vector<1x8xf32>
    %107 = tpu.matmul %101, %106, %cst_73 {dimension_numbers = #tpu.dot_dimension_numbers<[1], [0], [0], [1], [0, 0, 1, 1], [], []>} : vector<1x128xf32>, vector<128x8xf32>, vector<1x8xf32> -> vector<1x8xf32>
    %cst_74 = arith.constant 0.001953125 : f32
    %108 = vector.broadcast %cst_74 : f32 to vector<1x8xf32>
    %109 = arith.mulf %107, %108 : vector<1x8xf32>
    %110 = arith.mulf %105, %105 : vector<1x8xf32>
    %111 = arith.subf %109, %110 : vector<1x8xf32>
    %c0_75 = arith.constant 0 : index
    %c0_76 = arith.constant 0 : index
    %112 = vector.load %arg9[%c0_75, %c0_76] : memref<1x8xf32, #tpu.memory_space<vmem>>, vector<1x8xf32>
    %cst_77 = arith.constant 9.99999974E-6 : f32
    %113 = vector.broadcast %cst_77 : f32 to vector<1x8xf32>
    %114 = arith.addf %111, %113 : vector<1x8xf32>
    %115 = math.rsqrt %114 : vector<1x8xf32>
    %116 = arith.mulf %112, %115 : vector<1x8xf32>
    %c0_78 = arith.constant 0 : index
    %c0_79 = arith.constant 0 : index
    %117 = vector.load %arg10[%c0_78, %c0_79] : memref<1x8xf32, #tpu.memory_space<vmem>>, vector<1x8xf32>
    %118 = arith.mulf %105, %116 : vector<1x8xf32>
    %119 = arith.subf %117, %118 : vector<1x8xf32>
    %c0_80 = arith.constant 0 : index
    %c0_81 = arith.constant 0 : index
    %120 = vector.load %arg8[%c0_80, %c0_81] : memref<8x128xf32, #tpu.memory_space<vmem>>, vector<8x128xf32>
    %cst_82 = arith.constant dense<0.000000e+00> : vector<1x128xf32>
    %121 = tpu.matmul %116, %120, %cst_82 {dimension_numbers = #tpu.dot_dimension_numbers<[1], [0], [0], [1], [0, 0, 1, 1], [], []>} : vector<1x8xf32>, vector<8x128xf32>, vector<1x128xf32> -> vector<1x128xf32>
    %c0_83 = arith.constant 0 : index
    %c0_84 = arith.constant 0 : index
    %122 = vector.load %arg8[%c0_83, %c0_84] : memref<8x128xf32, #tpu.memory_space<vmem>>, vector<8x128xf32>
    %cst_85 = arith.constant dense<0.000000e+00> : vector<1x128xf32>
    %123 = tpu.matmul %119, %122, %cst_85 {dimension_numbers = #tpu.dot_dimension_numbers<[1], [0], [0], [1], [0, 0, 1, 1], [], []>} : vector<1x8xf32>, vector<8x128xf32>, vector<1x128xf32> -> vector<1x128xf32>
    %124 = vector.extract_strided_slice %87 {offsets = [0, 0], sizes = [16, 128], strides = [1, 1]} : vector<34x128xf32> to vector<16x128xf32>
    %125 = vector.broadcast %121 : vector<1x128xf32> to vector<16x128xf32>
    %126 = arith.mulf %124, %125 : vector<16x128xf32>
    %127 = vector.broadcast %123 : vector<1x128xf32> to vector<16x128xf32>
    %128 = arith.addf %126, %127 : vector<16x128xf32>
    %cst_86 = arith.constant 0.000000e+00 : f32
    %129 = vector.broadcast %cst_86 : f32 to vector<16x128xf32>
    %130 = arith.maximumf %128, %129 : vector<16x128xf32>
    %c0_87 = arith.constant 0 : index
    %c0_88 = arith.constant 0 : index
    %131 = vector.load %arg11[%c0_87, %c0_88] : memref<128x64xf32, #tpu.memory_space<vmem>>, vector<128x64xf32>
    %cst_89 = arith.constant dense<0.000000e+00> : vector<16x64xf32>
    %132 = tpu.matmul %130, %131, %cst_89 {dimension_numbers = #tpu.dot_dimension_numbers<[1], [0], [0], [1], [0, 0, 1, 1], [], []>} : vector<16x128xf32>, vector<128x64xf32>, vector<16x64xf32> -> vector<16x64xf32>
    %c0_90 = arith.constant 0 : index
    %c0_91 = arith.constant 0 : index
    %133 = vector.load %arg12[%c0_90, %c0_91] : memref<128x64xf32, #tpu.memory_space<vmem>>, vector<128x64xf32>
    %cst_92 = arith.constant dense<0.000000e+00> : vector<16x64xf32>
    %134 = tpu.matmul %130, %133, %cst_92 {dimension_numbers = #tpu.dot_dimension_numbers<[1], [0], [0], [1], [0, 0, 1, 1], [], []>} : vector<16x128xf32>, vector<128x64xf32>, vector<16x64xf32> -> vector<16x64xf32>
    %135 = arith.maximumf %132, %134 : vector<16x64xf32>
    %c0_93 = arith.constant 0 : index
    %c0_94 = arith.constant 0 : index
    %136 = vector.load %arg13[%c0_93, %c0_94] : memref<8x16xf32, #tpu.memory_space<vmem>>, vector<8x16xf32>
    %cst_95 = arith.constant dense<0.000000e+00> : vector<8x64xf32>
    %137 = tpu.matmul %136, %135, %cst_95 {dimension_numbers = #tpu.dot_dimension_numbers<[1], [0], [0], [1], [0, 0, 1, 1], [], []>} : vector<8x16xf32>, vector<16x64xf32>, vector<8x64xf32> -> vector<8x64xf32>
    %c0_96 = arith.constant 0 : index
    %c0_97 = arith.constant 0 : index
    %138 = vector.load %arg14[%c0_96, %c0_97] : memref<8x16xf32, #tpu.memory_space<vmem>>, vector<8x16xf32>
    %cst_98 = arith.constant dense<0.000000e+00> : vector<8x64xf32>
    %139 = tpu.matmul %138, %135, %cst_98 {dimension_numbers = #tpu.dot_dimension_numbers<[1], [0], [0], [1], [0, 0, 1, 1], [], []>} : vector<8x16xf32>, vector<16x64xf32>, vector<8x64xf32> -> vector<8x64xf32>
    %140 = arith.maximumf %137, %139 : vector<8x64xf32>
    %c0_99 = arith.constant 0 : index
    %c0_100 = arith.constant 0 : index
    %141 = vector.load %arg15[%c0_99, %c0_100] : memref<16x64xf32, #tpu.memory_space<vmem>>, vector<8x64xf32>
    tpu.vector_store %arg15[%c0_99, %c0_100], %140 {strides = array<i32>} : memref<16x64xf32, #tpu.memory_space<vmem>>, vector<8x64xf32>,
    %142 = vector.extract_strided_slice %87 {offsets = [18, 0], sizes = [16, 128], strides = [1, 1]} : vector<34x128xf32> to vector<16x128xf32>
    %143 = vector.broadcast %121 : vector<1x128xf32> to vector<16x128xf32>
    %144 = arith.mulf %142, %143 : vector<16x128xf32>
    %145 = vector.broadcast %123 : vector<1x128xf32> to vector<16x128xf32>
    %146 = arith.addf %144, %145 : vector<16x128xf32>
    %cst_101 = arith.constant 0.000000e+00 : f32
    %147 = vector.broadcast %cst_101 : f32 to vector<16x128xf32>
    %148 = arith.maximumf %146, %147 : vector<16x128xf32>
    %c0_102 = arith.constant 0 : index
    %c0_103 = arith.constant 0 : index
    %149 = vector.load %arg11[%c0_102, %c0_103] : memref<128x64xf32, #tpu.memory_space<vmem>>, vector<128x64xf32>
    %cst_104 = arith.constant dense<0.000000e+00> : vector<16x64xf32>
    %150 = tpu.matmul %148, %149, %cst_104 {dimension_numbers = #tpu.dot_dimension_numbers<[1], [0], [0], [1], [0, 0, 1, 1], [], []>} : vector<16x128xf32>, vector<128x64xf32>, vector<16x64xf32> -> vector<16x64xf32>
    %c0_105 = arith.constant 0 : index
    %c0_106 = arith.constant 0 : index
    %151 = vector.load %arg12[%c0_105, %c0_106] : memref<128x64xf32, #tpu.memory_space<vmem>>, vector<128x64xf32>
    %cst_107 = arith.constant dense<0.000000e+00> : vector<16x64xf32>
    %152 = tpu.matmul %148, %151, %cst_107 {dimension_numbers = #tpu.dot_dimension_numbers<[1], [0], [0], [1], [0, 0, 1, 1], [], []>} : vector<16x128xf32>, vector<128x64xf32>, vector<16x64xf32> -> vector<16x64xf32>
    %153 = arith.maximumf %150, %152 : vector<16x64xf32>
    %c0_108 = arith.constant 0 : index
    %c0_109 = arith.constant 0 : index
    %154 = vector.load %arg13[%c0_108, %c0_109] : memref<8x16xf32, #tpu.memory_space<vmem>>, vector<8x16xf32>
    %cst_110 = arith.constant dense<0.000000e+00> : vector<8x64xf32>
    %155 = tpu.matmul %154, %153, %cst_110 {dimension_numbers = #tpu.dot_dimension_numbers<[1], [0], [0], [1], [0, 0, 1, 1], [], []>} : vector<8x16xf32>, vector<16x64xf32>, vector<8x64xf32> -> vector<8x64xf32>
    %c0_111 = arith.constant 0 : index
    %c0_112 = arith.constant 0 : index
    %156 = vector.load %arg14[%c0_111, %c0_112] : memref<8x16xf32, #tpu.memory_space<vmem>>, vector<8x16xf32>
    %cst_113 = arith.constant dense<0.000000e+00> : vector<8x64xf32>
    %157 = tpu.matmul %156, %153, %cst_113 {dimension_numbers = #tpu.dot_dimension_numbers<[1], [0], [0], [1], [0, 0, 1, 1], [], []>} : vector<8x16xf32>, vector<16x64xf32>, vector<8x64xf32> -> vector<8x64xf32>
    %158 = arith.maximumf %155, %157 : vector<8x64xf32>
    %c8 = arith.constant 8 : index
    %c0_114 = arith.constant 0 : index
    %159 = vector.load %arg15[%c8, %c0_114] : memref<16x64xf32, #tpu.memory_space<vmem>>, vector<8x64xf32>
    tpu.vector_store %arg15[%c8, %c0_114], %158 {strides = array<i32>} : memref<16x64xf32, #tpu.memory_space<vmem>>, vector<8x64xf32>,
    return
  }
}

</mosaic_0001>

<bundles_post_ra>
// kernel: tpu_custom_call.1
= control target key start
LH: loop header
LB: loop body
LE: loop exit
PB: predicated region body
PF: predicated region fallthrough
CT: control target
= control target key end

     0   :  { %v3398_v1 = vmov 0.0   ;;  %vm3399_vm0 = vmmov 0   ;;  %vm109_vm1 = vcmask 523264   ;;  %s4255_s0 = inlined_call_operand.vmem [shape: f32[36,64], index: 0, kind: input, shape index: {}]   ;;  %s4256_s1 = inlined_call_operand.vmem [shape: bf16[3,64,128], index: 1, kind: input, shape index: {}]   ;;  %s4257_s2 = inlined_call_operand.vmem [shape: f32[128,8], index: 2, kind: input, shape index: {}]   ;;  %s4258_s3 = inlined_call_operand.vmem [shape: f32[8,128], index: 3, kind: input, shape index: {}]   ;;  %s4259_s4 = inlined_call_operand.vmem [shape: f32[1,8], index: 4, kind: input, shape index: {}]   ;;  %s4260_s5 = inlined_call_operand.vmem [shape: f32[1,8], index: 5, kind: input, shape index: {}]   ;;  %s4261_s6 = inlined_call_operand.vmem [shape: bf16[3,128,128], index: 6, kind: input, shape index: {}]   ;;  %s4262_s7 = inlined_call_operand.vmem [shape: f32[128,8], index: 7, kind: input, shape index: {}]   ;;  %s4263_s8 = inlined_call_operand.vmem [shape: f32[8,128], index: 8, kind: input, shape index: {}]   ;;  %s4264_s9 = inlined_call_operand.vmem [shape: f32[1,8], index: 9, kind: input, shape index: {}]   ;;  %s4265_s10 = inlined_call_operand.vmem [shape: f32[1,8], index: 10, kind: input, shape index: {}]   ;;  %s4266_s11 = inlined_call_operand.vmem [shape: f32[128,64], index: 11, kind: input, shape index: {}]   ;;  %s4267_s12 = inlined_call_operand.vmem [shape: f32[128,64], index: 12, kind: input, shape index: {}]   ;;  %s4268_s13 = inlined_call_operand.vmem [shape: f32[8,16], index: 13, kind: input, shape index: {}]   ;;  %s4269_s14 = inlined_call_operand.vmem [shape: f32[8,16], index: 14, kind: input, shape index: {}]   ;;  %s4270_s15 = inlined_call_operand.hbm [shape: f32[16,64], index: 15, kind: output, shape index: {}]  }
   0x1   :  { %v3334_v0 = vld [vmem:[%s4256_s1 + $0x20] sm:$0xff]   ;;  %2572 = vmatprep.subr.bf16.mxu0 %v3398_v1  ;;  %746 = vst [vmem:[#allocation2] sm:$0xff] %v3398_v1  ;;  %747 = vst [vmem:[#allocation2 + $0x8] sm:$0xff] %v3398_v1  ;;  %v3335_v2 = vld [vmem:[%s4256_s1 + $0x28] sm:$0xff]   ;;  %2580 = vmatprep.mubr.msk.bf16.mxu0 %vm3399_vm0, %v3398_v1 }
   0x2   :  { %748 = vst [vmem:[#allocation2 + $0x10] sm:$0xff] %v3398_v1  ;;  %749 = vst [vmem:[#allocation2 + $0x18] sm:$0xff] %v3398_v1  ;;  %2573 = vmatpush3.bf16.msra.mxu0 %v3334_v0  ;;  %2664 = vmatprep.mubr.msk.f32.mxu1 %vm3399_vm0, %v3398_v1  ;;  %v3336_v3 = vld [vmem:[%s4256_s1 + $0x30] sm:$0xff]   ;;  %v3337_v4 = vld [vmem:[%s4256_s1 + $0x38] sm:$0xff]  }
   0x3   :  { %750 = vst [vmem:[#allocation2 + $0x20] sm:$0xf] %v3398_v1  ;;  %2574 = vmatprep.subr.bf16.mxu0 %v3398_v1  ;;  %v68_v5 = vld [vmem:[%s4255_s0 + $0x1] sm:$0xff]  ;;  %v69_v6 = vld [vmem:[%s4255_s0 + $0x9] sm:$0xff]  ;;  %v70_v10 = vld [vmem:[%s4255_s0 + $0x11] sm:$0xff] }
   0x4   :  { %v73_v7 = vpack.c.bf16 %v69_v6, %v68_v5  ;;  %v3338_v8 = vld [vmem:[%s4256_s1] sm:$0xff]   ;;  %v3339_v9 = vld [vmem:[%s4256_s1 + $0x8] sm:$0xff]   ;;  %v3340_v12 = vld [vmem:[%s4256_s1 + $0x10] sm:$0xff]  }
   0x5   :  { %v71_v11 = vld [vmem:[%s4255_s0 + $0x19] sm:$0xff]  ;;  %v72_v14 = vld [vmem:[%s4255_s0 + $0x21] sm:$0x3] }
   0x6   :  { %2575 = vmatpush3.bf16.msra.mxu0 %v3335_v2  ;;  %v74_v13 = vpack.c.bf16 %v71_v11, %v70_v10  ;;  %v3341_v15 = vld [vmem:[%s4256_s1 + $0x18] sm:$0xff]   ;;  %v75_v16 = vpack.c.bf16 %v72_v14, %v72_v14 }
   0x7   :  { %2576 = vmatprep.subr.bf16.mxu0 %v3398_v1 }
   0xa   :  { %2577 = vmatpush3.bf16.msra.mxu0 %v3336_v3 }
   0xb   :  { %2578 = vmatprep.subr.bf16.mxu0 %v3398_v1 }
   0xe   :  { %2579 = vmatpush3.bf16.msra.mxu0 %v3337_v4 }
   0xf   :  { %2592 = vmatprep.subr.bf16.mxu0 %v3398_v1 }
  0x11   :  { %2581 = vmatmul.mubr.msk.bf16.vlgmr.msra.gmra.mrb[0].mxu0 %vm109_vm1, %v73_v7 }
  0x12   :  { %2593 = vmatpush3.bf16.msra.mxu0 %v3338_v8  ;;  %2584 = vmatprep.mubr.msk.bf16.mxu0 %vm3399_vm0, %v3398_v1 }
  0x13   :  { %2594 = vmatprep.subr.bf16.mxu0 %v3398_v1 }
  0x16   :  { %2595 = vmatpush3.bf16.msra.mxu0 %v3339_v9 }
  0x17   :  { %2596 = vmatprep.subr.bf16.mxu0 %v3398_v1 }
  0x19   :  { %2585 = vmatmul.mubr.msk.bf16.gmra.mrb[4].mxu0 %vm109_vm1, %v74_v13 }
  0x1a   :  { %2597 = vmatpush3.bf16.msra.mxu0 %v3340_v12  ;;  %2588 = vmatprep.mubr.msk.bf16.mxu0 %vm3399_vm0, %v3398_v1 }
  0x1b   :  { %2598 = vmatprep.subr.bf16.mxu0 %v3398_v1 }
  0x1e   :  { %2599 = vmatpush3.bf16.msra.mxu0 %v3341_v15 }
  0x1f   :  { %2612 = vmatprep.subr.bf16.mxu0 %v3398_v1 }
  0x21   :  { %2589 = vmatmul.mubr.msk.bf16.gmra.mrb[8].mxu0 %vm109_vm1, %v75_v16 }
  0x22   :  { %20 = vsyncpa [#allocation4], 0  ;;  %2600 = vmatprep.mubr.msk.bf16.mxu0 %vm3399_vm0, %v3398_v1  ;;  %v52_v17 = vld [vmem:[%s4255_s0] sm:$0xff]  ;;  %v53_v18 = vld [vmem:[%s4255_s0 + $0x8] sm:$0xff]  ;;  %v3400_v40 = vmov 0.0|0.0   ;;  %vm394_vm2 = vcmask 1045504  }
  0x23   :  { %v57_v19 = vpack.c.bf16 %v53_v18, %v52_v17  ;;  %v3342_v20 = vld [vmem:[%s4256_s1 + $0x40] sm:$0xff]   ;;  %v3343_v21 = vld [vmem:[%s4256_s1 + $0x48] sm:$0xff]   ;;  %v54_v22 = vld [vmem:[%s4255_s0 + $0x10] sm:$0xff]  ;;  %3044 = vmatprep.subr.bf16.mxu1 %v3400_v40  ;;  %vm599_vm3 = vcmask 64512   ;;  %vm1738_vm4 = vcmask 130048  }
  0x24   :  { %v55_v23 = vld [vmem:[%s4255_s0 + $0x18] sm:$0xff]  ;;  %v3344_v25 = vld [vmem:[%s4256_s1 + $0x50] sm:$0xff]   ;;  %v56_v26 = vld [vmem:[%s4255_s0 + $0x20] sm:$0x3] }
  0x25   :  { %v58_v24 = vpack.c.bf16 %v55_v23, %v54_v22  ;;  %v3345_v27 = vld [vmem:[%s4256_s1 + $0x58] sm:$0xff]   ;;  %v59_v28 = vpack.c.bf16 %v56_v26, %v56_v26  ;;  %v264_v29 = vld [vmem:[%s4255_s0 + $0x2] sm:$0xff]  ;;  %v265_v30 = vld [vmem:[%s4255_s0 + $0xa] sm:$0xff] }
  0x26   :  { %v269_v31 = vpack.c.bf16 %v265_v30, %v264_v29  ;;  %v266_v32 = vld [vmem:[%s4255_s0 + $0x12] sm:$0xff]  ;;  %v267_v33 = vld [vmem:[%s4255_s0 + $0x1a] sm:$0xff]  ;;  %v268_v35 = vld [vmem:[%s4255_s0 + $0x22] sm:$0x3] }
  0x27   :  { %v270_v34 = vpack.c.bf16 %v267_v33, %v266_v32  ;;  %v271_v36 = vpack.c.bf16 %v268_v35, %v268_v35  ;;  %v431_v37 = vld [vmem:[%s4257_s2] sm:$0xff]  ;;  %v432_v38 = vld [vmem:[%s4257_s2 + $0x8] sm:$0xff]  ;;  %v433_v41 = vld [vmem:[%s4257_s2 + $0x10] sm:$0xff] }
  0x28   :  { %v3620_v39 = vpack.c.bf16 %v432_v38, %v431_v37  ;;  %v434_v42 = vld [vmem:[%s4257_s2 + $0x18] sm:$0xff]  ;;  %v435_v44 = vld [vmem:[%s4257_s2 + $0x20] sm:$0xff]  ;;  %v436_v45 = vld [vmem:[%s4257_s2 + $0x28] sm:$0xff] }
  0x29   :  { %2601 = vmatmul.mubr.msk.bf16.vlgmr.msra.gmra.mrb[0].mxu0 %vm109_vm1, %v57_v19  ;;  %v3631_v43 = vpack.c.bf16 %v434_v42, %v433_v41  ;;  %v3641_v46 = vpack.c.bf16 %v436_v45, %v435_v44  ;;  %v437_v47 = vld [vmem:[%s4257_s2 + $0x30] sm:$0xff]  ;;  %v438_v48 = vld [vmem:[%s4257_s2 + $0x38] sm:$0xff]  ;;  %v439_v50 = vld [vmem:[%s4257_s2 + $0x40] sm:$0xff] }
  0x2a   :  { %2613 = vmatpush3.bf16.msra.mxu0 %v3342_v20  ;;  %2604 = vmatprep.mubr.msk.bf16.mxu0 %vm3399_vm0, %v3398_v1  ;;  %v3651_v49 = vpack.c.bf16 %v438_v48, %v437_v47  ;;  %v440_v51 = vld [vmem:[%s4257_s2 + $0x48] sm:$0xff]  ;;  %v441_v53 = vld [vmem:[%s4257_s2 + $0x50] sm:$0xff]  ;;  %v442_v54 = vld [vmem:[%s4257_s2 + $0x58] sm:$0xff] }
  0x2b   :  { %2614 = vmatprep.subr.bf16.mxu0 %v3398_v1  ;;  %3046 = vmatpush3.bf16.msra.mxu1 %v3620_v39  ;;  %v3661_v52 = vpack.c.bf16 %v440_v51, %v439_v50  ;;  %v3671_v55 = vpack.c.bf16 %v442_v54, %v441_v53  ;;  %v443_v56 = vld [vmem:[%s4257_s2 + $0x60] sm:$0xff]  ;;  %v444_v57 = vld [vmem:[%s4257_s2 + $0x68] sm:$0xff]  ;;  %v445_v58 = vld [vmem:[%s4257_s2 + $0x70] sm:$0xff] }
  0x2c   :  { %3047 = vmatprep.subr.bf16.mxu1 %v3400_v40  ;;  %v3684_v59 = vpack.c.bf16 %v444_v57, %v443_v56  ;;  %v446_v60 = vld [vmem:[%s4257_s2 + $0x78] sm:$0xff] }
  0x2d   :  { %v3690_v61 = vpack.c.bf16 %v446_v60, %v445_v58 }
  0x2e   :  { %2615 = vmatpush3.bf16.msra.mxu0 %v3343_v21 }
  0x2f   :  { %2616 = vmatprep.subr.bf16.mxu0 %v3398_v1  ;;  %3049 = vmatpush3.bf16.msra.mxu1 %v3631_v43 }
  0x30   :  { %3050 = vmatprep.subr.bf16.mxu1 %v3400_v40 }
  0x31   :  { %2605 = vmatmul.mubr.msk.bf16.gmra.mrb[4].mxu0 %vm109_vm1, %v58_v24 }
  0x32   :  { %2617 = vmatpush3.bf16.msra.mxu0 %v3344_v25  ;;  %2608 = vmatprep.mubr.msk.bf16.mxu0 %vm3399_vm0, %v3398_v1 }
  0x33   :  { %2618 = vmatprep.subr.bf16.mxu0 %v3398_v1  ;;  %3052 = vmatpush3.bf16.msra.mxu1 %v3641_v46 }
  0x34   :  { %3053 = vmatprep.subr.bf16.mxu1 %v3400_v40 }
  0x36   :  { %2619 = vmatpush3.bf16.msra.mxu0 %v3345_v27 }
  0x37   :  { %2712 = vmatprep.subr.bf16.mxu0 %v3398_v1  ;;  %3055 = vmatpush3.bf16.msra.mxu1 %v3651_v49 }
  0x38   :  { %3056 = vmatprep.subr.bf16.mxu1 %v3400_v40 }
  0x39   :  { %2609 = vmatmul.mubr.msk.bf16.gmra.mrb[8].mxu0 %vm109_vm1, %v59_v28 }
  0x3a   :  { %2620 = vmatprep.mubr.msk.bf16.mxu0 %vm3399_vm0, %v3398_v1 }
  0x3b   :  { %3058 = vmatpush3.bf16.msra.mxu1 %v3661_v52 }
  0x3c   :  { %3059 = vmatprep.subr.bf16.mxu1 %v3400_v40 }
  0x3f   :  { %3061 = vmatpush3.bf16.msra.mxu1 %v3671_v55 }
  0x40   :  { %3062 = vmatprep.subr.bf16.mxu1 %v3400_v40 }
  0x41   :  { %2621 = vmatmul.mubr.msk.bf16.vlgmr.msra.gmra.mrb[0].mxu0 %vm109_vm1, %v269_v31 }
  0x42   :  { %2624 = vmatprep.mubr.msk.bf16.mxu0 %vm3399_vm0, %v3398_v1 }
  0x43   :  { %3064 = vmatpush3.bf16.msra.mxu1 %v3684_v59 }
  0x44   :  { %3065 = vmatprep.subr.bf16.mxu1 %v3400_v40 }
  0x47   :  { %3067 = vmatpush3.bf16.msra.mxu1 %v3690_v61 }
  0x48   :  { %3068 = vmatprep.subr.bf16.mxu1 %v3400_v40 }
  0x49   :  { %2625 = vmatmul.mubr.msk.bf16.gmra.mrb[4].mxu0 %vm109_vm1, %v270_v34 }
  0x4a   :  { %2628 = vmatprep.mubr.msk.bf16.mxu0 %vm3399_vm0, %v3398_v1 }
  0x51   :  { %2629 = vmatmul.mubr.msk.bf16.gmra.mrb[8].mxu0 %vm109_vm1, %v271_v36 }
  0x52   :  { %2728 = vmatprep.mubr.msk.bf16.mxu0 %vm3399_vm0, %v3398_v1 }
 0x114   :  { %v3695_v62 = vpop.f32.mrb[0].mxu0 }
 0x115   :  { %v2622_v63 = vpop.f32.mrb[1].mxu0  ;;  %v382_v2 = vmul.f32 %v3695_v62, %v3695_v62 }
 0x116   :  { %v3697_v0 = vpop.f32.mrb[2].mxu0 }
 0x117   :  { %v375_v3 = vadd.f32 %v3697_v0, %v3695_v62  ;;  %v383_v4 = vmul.f32 %v3697_v0, %v3697_v0  ;;  %v2623_v5 = vpop.f32.mrb[3].mxu0 }
 0x119   :  { %v384_v6 = vadd.f32 %v383_v4, %v382_v2  ;;  %v376_v14 = vrot.slane %v375_v3, 4 }
 0x11b   :  { %v385_v17 = vrot.slane %v384_v6, 4  ;;  %v377_v20 = vadd.f32 %v376_v14, %v375_v3  ;;  %v595_v14 = vld [vmem:[%s4260_s5] sm:$0x1] }
 0x11c   :  { %v3705_v7 = vpop.f32.mrb[4].mxu0 }
 0x11d   :  { %v2626_v8 = vpop.f32.mrb[5].mxu0  ;;  %v409_v9 = vmul.f32 %v3705_v7, %v3705_v7  ;;  %v395_v11 = vrot.slane %v3705_v7, 2  ;;  %v386_v26 = vadd.f32 %v385_v17, %v384_v6  ;;  %v378_v31 = vrot.slane %v377_v20, 2  ;;  %v3349_v17 = vld [vmem:[%s4261_s6 + $0x58] sm:$0xff]  }
 0x11e   :  { %v3709_v10 = vpop.f32.mrb[6].mxu0 }
 0x11f   :  { %v396_v12 = vrot.slane %v3709_v10, 2  ;;  %v2627_v13 = vpop.f32.mrb[7].mxu0  ;;  %v410_v15 = vmul.f32 %v3709_v10, %v3709_v10  ;;  %v415_v18 = vrot.slane %v409_v9, 2  ;;  %v387_v34 = vrot.slane %v386_v26, 2 }
 0x120   :  { %v379_v37 = vadd.f32 %v378_v31, %v377_v20  ;;  %v3352_v20 = vld [vmem:[%s4261_s6 + $0x70] sm:$0xff]  }
 0x121   :  { %v397_v16 = vsel %vm394_vm2, %v395_v11, %v396_v12  ;;  %v416_v19 = vrot.slane %v410_v15, 2  ;;  %v388_v42 = vadd.f32 %v387_v34, %v386_v26  ;;  %v591_v11 = vld [vmem:[%s4259_s4] sm:$0x1] }
 0x122   :  { %v380_v47 = vrot.slane %v379_v37, 1 }
 0x123   :  { %v417_v21 = vsel %vm394_vm2, %v415_v18, %v416_v19  ;;  %v389_v53 = vrot.slane %v388_v42, 1  ;;  %v3350_v18 = vld [vmem:[%s4261_s6 + $0x60] sm:$0xff]  }
 0x124   :  { %v3717_v22 = vpop.f32.mrb[8].mxu0  ;;  %v381_v56 = vadd.f32 %v380_v47, %v379_v37 }
 0x125   :  { %v398_v23 = vrot.slane %v3717_v22, 2  ;;  %v411_v24 = vmul.f32 %v3717_v22, %v3717_v22  ;;  %v2630_v25 = vpop.f32.mrb[9].mxu0  ;;  %v390_v63 = vadd.f32 %v389_v53, %v388_v42 }
 0x126   :  { %v367_v27 = vpop.f32.mrb[10].mxu0 }
 0x127   :  { %v399_v28 = vsel %vm394_vm2, %v396_v12, %v398_v23  ;;  %v418_v29 = vrot.slane %v411_v24, 2  ;;  %v2631_v30 = vpop.f32.mrb[11].mxu0  ;;  %v751_v23 = vlaneseq }
 0x128   :  { %v402_v32 = vadd.f32 %v399_v28, %v397_v16 }
 0x129   :  { %v419_v33 = vsel %vm394_vm2, %v416_v19, %v418_v29  ;;  %v3351_v19 = vld [vmem:[%s4261_s6 + $0x68] sm:$0xff]   ;;  %v752_v24 = vshrl.u32 %v751_v23, 7 }
 0x12a   :  { %v403_v35 = vrot.slane %v402_v32, 4  ;;  %v422_v36 = vadd.f32 %v419_v33, %v417_v21  ;;  %v3353_v21 = vld [vmem:[%s4261_s6 + $0x78] sm:$0xff]   ;;  %v1226_v23 = vld [vmem:[%s4262_s7 + $0x8] sm:$0xff] }
 0x12b   :  { %v3793_v25 = vsub.s32 0, %v752_v24 }
 0x12c   :  { %v423_v38 = vrot.slane %v422_v36, 4  ;;  %v404_v41 = vadd.f32 %v403_v35, %v402_v32 }
 0x12e   :  { %v424_v44 = vadd.f32 %v423_v38, %v422_v36  ;;  %v405_v45 = vrot.slane %v404_v41, 2 }
 0x130   :  { %v406_v48 = vadd.f32 %v405_v45, %v404_v41  ;;  %v425_v50 = vrot.slane %v424_v44, 2 }
 0x132   :  { %v407_v51 = vrot.slane %v406_v48, 1  ;;  %v426_v54 = vadd.f32 %v425_v50, %v424_v44 }
 0x134   :  { %v408_v57 = vadd.f32 %v407_v51, %v406_v48  ;;  %v427_v58 = vrot.slane %v426_v54, 1  ;;  %v3356_v51 = vld [vmem:[%s4261_s6 + $0x10] sm:$0xff]  }
 0x136   :  { %v429_v60 = vadd.f32 %v408_v57, %v381_v56  ;;  %v428_v2 = vadd.f32 %v427_v58, %v426_v54  ;;  %v3357_v54 = vld [vmem:[%s4261_s6 + $0x18] sm:$0xff]   ;;  %v3358_v57 = vld [vmem:[%s4261_s6 + $0x20] sm:$0xff]  }
 0x138   :  { %2665 = vmatmul.mubr.f32.vlgmr.msra.gmra.mrb[0].mxu1 %v429_v60  ;;  %v430_v3 = vadd.f32 %v428_v2, %v390_v63  ;;  %v3359_v60 = vld [vmem:[%s4261_s6 + $0x28] sm:$0xff]   ;;  %v3360_v63 = vld [vmem:[%s4261_s6 + $0x30] sm:$0xff]   ;;  %v3361_v2 = vld [vmem:[%s4261_s6 + $0x38] sm:$0xff]  }
 0x139   :  { %3070 = vmatpush3.bf16.msra.mxu1 %v3620_v39  ;;  %2699 = vmatprep.mubr.msk.f32.mxu1 %vm3399_vm0, %v3398_v1  ;;  %v598_v39 = vld [vmem:[%s4258_s3] sm:$0xff] }
 0x13a   :  { %3071 = vmatprep.subr.bf16.mxu1 %v3400_v40 }
 0x13d   :  { %3073 = vmatpush3.bf16.msra.mxu1 %v3631_v43  ;;  %v3346_v43 = vld [vmem:[%s4261_s6 + $0x40] sm:$0xff]  }
 0x13e   :  { %3074 = vmatprep.subr.bf16.mxu1 %v3400_v40  ;;  %2713 = vmatpush3.bf16.msra.mxu0 %v3346_v43  ;;  %v3362_v43 = vld [vmem:[%s4261_s6 + $0x80] sm:$0xff]  }
 0x13f   :  { %2714 = vmatprep.subr.bf16.mxu0 %v3398_v1 }
 0x141   :  { %3076 = vmatpush3.bf16.msra.mxu1 %v3641_v46  ;;  %v3347_v46 = vld [vmem:[%s4261_s6 + $0x48] sm:$0xff]  }
 0x142   :  { %3077 = vmatprep.subr.bf16.mxu1 %v3400_v40  ;;  %2715 = vmatpush3.bf16.msra.mxu0 %v3347_v46 }
 0x143   :  { %2716 = vmatprep.subr.bf16.mxu0 %v3398_v1 }
 0x145   :  { %3079 = vmatpush3.bf16.msra.mxu1 %v3651_v49  ;;  %v3348_v49 = vld [vmem:[%s4261_s6 + $0x50] sm:$0xff]  }
 0x146   :  { %3080 = vmatprep.subr.bf16.mxu1 %v3400_v40  ;;  %2717 = vmatpush3.bf16.msra.mxu0 %v3348_v49  ;;  %v3363_v49 = vld [vmem:[%s4261_s6 + $0x88] sm:$0xff]  }
 0x147   :  { %2718 = vmatprep.subr.bf16.mxu0 %v3398_v1 }
 0x149   :  { %3082 = vmatpush3.bf16.msra.mxu1 %v3661_v52 }
 0x14a   :  { %3083 = vmatprep.subr.bf16.mxu1 %v3400_v40  ;;  %2719 = vmatpush3.bf16.msra.mxu0 %v3349_v17 }
 0x14b   :  { %2720 = vmatprep.subr.bf16.mxu0 %v3398_v1 }
 0x14d   :  { %3085 = vmatpush3.bf16.msra.mxu1 %v3671_v55 }
 0x14e   :  { %3086 = vmatprep.subr.bf16.mxu1 %v3400_v40  ;;  %2721 = vmatpush3.bf16.msra.mxu0 %v3350_v18 }
 0x14f   :  { %2722 = vmatprep.subr.bf16.mxu0 %v3398_v1 }
 0x151   :  { %3088 = vmatpush3.bf16.msra.mxu1 %v3684_v59 }
 0x152   :  { %3089 = vmatprep.subr.bf16.mxu1 %v3400_v40  ;;  %2723 = vmatpush3.bf16.msra.mxu0 %v3351_v19 }
 0x153   :  { %2724 = vmatprep.subr.bf16.mxu0 %v3398_v1 }
 0x155   :  { %3091 = vmatpush3.bf16.msra.mxu1 %v3690_v61 }
 0x156   :  { %2702 = vmatprep.subr.mxu1 %v3398_v1  ;;  %2725 = vmatpush3.bf16.msra.mxu0 %v3352_v20 }
 0x157   :  { %2726 = vmatprep.subr.bf16.mxu0 %v3398_v1 }
 0x158   :  { %2700 = vmatmul.mubr.f32.vlgmr.msra.gmra.mrb[2].mxu1 %v430_v3 }
 0x159   :  { %2704 = vmatprep.mubr.msk.f32.mxu1 %vm3399_vm0, %v3398_v1  ;;  %2703 = vmatpush3.msra.mxu1 %v598_v39 }
 0x15a   :  { %2707 = vmatprep.subr.mxu1 %v3398_v1  ;;  %2727 = vmatpush3.bf16.msra.mxu0 %v3353_v21  ;;  %v1225_v21 = vld [vmem:[%s4262_s7] sm:$0xff] }
 0x15b   :  { %2740 = vmatprep.subr.bf16.mxu0 %v3398_v1  ;;  %v3887_v24 = vpack.c.bf16 %v1226_v23, %v1225_v21 }
 0x20b   :  { %v513_v52 = vpop.f32.mrb[0].mxu1 }
 0x20c   :  { %v2666_v55 = vpop.f32.mrb[1].mxu1  ;;  %v517_v59 = vmul.f32 0.001953125, %v513_v52 }
 0x20e   :  { %v589_v4 = vmul.f32 %v517_v59, %v517_v59 }
 0x22b   :  { %v584_v61 = vpop.f32.mrb[2].mxu1 }
 0x22c   :  { %v588_v5 = vmul.f32 0.001953125, %v584_v61  ;;  %v2701_v6 = vpop.f32.mrb[3].mxu1 }
 0x22d   :  { %v3366_v6 = vld [vmem:[%s4261_s6 + $0xa0] sm:$0xff]  }
 0x22e   :  { %v590_v8 = vsub.f32 %v588_v5, %v589_v4  ;;  %v3365_v4 = vld [vmem:[%s4261_s6 + $0x98] sm:$0xff]  }
 0x230   :  { %v592_v9 = vadd.f32 1e-05, %v590_v8 }
 0x232   :  { %3370 = vrsqrt.f32 %v592_v9  ;;  %v3367_v9 = vld [vmem:[%s4261_s6 + $0xa8] sm:$0xff]  }
 0x23c   :  { %v3371_v12 = vpop.eup %3370 }
 0x23d   :  { %v594_v13 = vmul.f32 %v3371_v12, %v591_v11  ;;  %v3368_v11 = vld [vmem:[%s4261_s6 + $0xb0] sm:$0xff]   ;;  %v3369_v12 = vld [vmem:[%s4261_s6 + $0xb8] sm:$0xff]  }
 0x23f   :  { %2705 = vmatmul.mubr.msk.f32.vlgmr.msra.gmra.mrb[4].mxu1 %vm599_vm3, %v594_v13  ;;  %v596_v15 = vmul.f32 %v594_v13, %v517_v59  ;;  %v3364_v59 = vld [vmem:[%s4261_s6 + $0x90] sm:$0xff]  }
 0x240   :  { %2708 = vmatpush3.msra.mxu1 %v598_v39  ;;  %2709 = vmatprep.mubr.msk.f32.mxu1 %vm3399_vm0, %v3398_v1 }
 0x241   :  { %v597_v16 = vsub.f32 %v595_v14, %v596_v15  ;;  %3092 = vmatprep.subr.bf16.mxu1 %v3400_v40 }
 0x243   :  { %2710 = vmatmul.mubr.msk.f32.vlgmr.msra.gmra.mrb[6].mxu1 %vm599_vm3, %v597_v16 }
 0x244   :  { %2828 = vmatprep.mubr.msk.f32.mxu1 %vm3399_vm0, %v3398_v1  ;;  %3094 = vmatpush3.bf16.msra.mxu1 %v3887_v24 }
 0x245   :  { %3095 = vmatprep.subr.bf16.mxu1 %v3400_v40 }
 0x312   :  { %v669_v26 = vpop.f32.mrb[4].mxu1 }
 0x313   :  { %v754_v27 = vrot.slane %v669_v26, %v3793_v25  ;;  %v2706_v28 = vpop.f32.mrb[5].mxu1  ;;  %v1227_v26 = vld [vmem:[%s4262_s7 + $0x10] sm:$0xff] }
 0x315   :  { %v755_v29 = vmul.f32 %v754_v27, %v3695_v62  ;;  %v756_v30 = vmul.f32 %v754_v27, %v3697_v0  ;;  %v767_v31 = vmul.f32 %v754_v27, %v3705_v7  ;;  %v768_v32 = vmul.f32 %v754_v27, %v3709_v10  ;;  %v3354_v7 = vld [vmem:[%s4261_s6] sm:$0xff]  }
 0x316   :  { %v769_v33 = vmul.f32 %v754_v27, %v3717_v22  ;;  %v742_v34 = vpop.f32.mrb[6].mxu1  ;;  %v3355_v22 = vld [vmem:[%s4261_s6 + $0x8] sm:$0xff]   ;;  %v1228_v27 = vld [vmem:[%s4262_s7 + $0x18] sm:$0xff] }
 0x317   :  { %v760_v35 = vrot.slane %v742_v34, %v3793_v25  ;;  %v2711_v36 = vpop.f32.mrb[7].mxu1  ;;  %v3897_v28 = vpack.c.bf16 %v1228_v27, %v1227_v26 }
 0x318   :  { %v1234_v36 = vld [vmem:[%s4262_s7 + $0x48] sm:$0xff] }
 0x319   :  { %v761_v37 = vadd.f32 %v760_v35, %v755_v29  ;;  %v762_v38 = vadd.f32 %v760_v35, %v756_v30  ;;  %v770_v41 = vadd.f32 %v767_v31, %v760_v35  ;;  %v771_v42 = vadd.f32 %v768_v32, %v760_v35  ;;  %3097 = vmatpush3.bf16.msra.mxu1 %v3897_v28  ;;  %v1229_v29 = vld [vmem:[%s4262_s7 + $0x20] sm:$0xff]  ;;  %v1230_v30 = vld [vmem:[%s4262_s7 + $0x28] sm:$0xff]  ;;  %v1231_v32 = vld [vmem:[%s4262_s7 + $0x30] sm:$0xff] }
 0x31a   :  { %v772_v44 = vadd.f32 %v769_v33, %v760_v35  ;;  %3098 = vmatprep.subr.bf16.mxu1 %v3400_v40  ;;  %v3907_v31 = vpack.c.bf16 %v1230_v30, %v1229_v29  ;;  %v1232_v33 = vld [vmem:[%s4262_s7 + $0x38] sm:$0xff]  ;;  %v1233_v35 = vld [vmem:[%s4262_s7 + $0x40] sm:$0xff] }
 0x31b   :  { %v763_v45 = vmax.f32 %v761_v37, 0.0  ;;  %v764_v47 = vmax.f32 %v762_v38, 0.0  ;;  %v773_v62 = vmax.f32 %v770_v41, 0.0  ;;  %v774_v48 = vmax.f32 %v771_v42, 0.0  ;;  %v1235_v38 = vld [vmem:[%s4262_s7 + $0x50] sm:$0xff]  ;;  %v1236_v41 = vld [vmem:[%s4262_s7 + $0x58] sm:$0xff] }
 0x31c   :  { %v775_v0 = vmax.f32 %v772_v44, 0.0  ;;  %v3917_v34 = vpack.c.bf16 %v1232_v33, %v1231_v32  ;;  %v3927_v37 = vpack.c.bf16 %v1234_v36, %v1233_v35  ;;  %v3937_v42 = vpack.c.bf16 %v1236_v41, %v1235_v38  ;;  %v1237_v44 = vld [vmem:[%s4262_s7 + $0x60] sm:$0xff] }
 0x31d   :  { %765 = vst [vmem:[#allocation2 + $0x1] sm:$0xff] %v763_v45  ;;  %766 = vst [vmem:[#allocation2 + $0x9] sm:$0xff] %v764_v47  ;;  %v808_v10 = vpack.c.bf16 %v764_v47, %v763_v45  ;;  %3100 = vmatpush3.bf16.msra.mxu1 %v3907_v31  ;;  %v1238_v45 = vld [vmem:[%s4262_s7 + $0x68] sm:$0xff] }
 0x31e   :  { %776 = vst [vmem:[#allocation2 + $0x11] sm:$0xfc] %v773_v62  ;;  %777 = vst [vmem:[#allocation2 + $0x19] sm:$0xff] %v774_v48  ;;  %3101 = vmatprep.subr.bf16.mxu1 %v3400_v40  ;;  %v3947_v47 = vpack.c.bf16 %v1238_v45, %v1237_v44  ;;  %v1239_v62 = vld [vmem:[%s4262_s7 + $0x70] sm:$0xff] }
 0x31f   :  { %778 = vst [vmem:[#allocation2 + $0x21] sm:$0x3] %v775_v0  ;;  %2729 = vmatmul.mubr.bf16.vlgmr.msra.gmra.mrb[12].mxu0 %v808_v10 }
 0x320   :  { %2741 = vmatpush3.bf16.msra.mxu0 %v3354_v7  ;;  %2732 = vmatprep.mubr.msk.bf16.mxu0 %vm3399_vm0, %v3398_v1 }
 0x321   :  { %2742 = vmatprep.subr.bf16.mxu0 %v3398_v1  ;;  %3103 = vmatpush3.bf16.msra.mxu1 %v3917_v34 }
 0x322   :  { %3104 = vmatprep.subr.bf16.mxu1 %v3400_v40 }
 0x324   :  { %2743 = vmatpush3.bf16.msra.mxu0 %v3355_v22  ;;  %v779_v3 = vld [vmem:[#allocation2] sm:$0xff]  ;;  %v780_v39 = vld [vmem:[#allocation2 + $0x8] sm:$0xff] }
 0x325   :  { %v805_v50 = vld [vmem:[#allocation2 + $0x11] sm:$0xff]  ;;  %2744 = vmatprep.subr.bf16.mxu0 %v3398_v1  ;;  %v784_v46 = vpack.c.bf16 %v780_v39, %v779_v3  ;;  %v1036_v13 = vld [vmem:[#allocation2 + $0x2] sm:$0xff]  ;;  %3106 = vmatpush3.bf16.msra.mxu1 %v3927_v37 }
 0x326   :  { %v809_v53 = vpack.c.bf16 %v774_v48, %v805_v50  ;;  %v807_v56 = vld [vmem:[#allocation2 + $0x21] sm:$0x3]  ;;  %v781_v52 = vld [vmem:[#allocation2 + $0x10] sm:$0xff]  ;;  %v782_v55 = vld [vmem:[#allocation2 + $0x18] sm:$0xff]  ;;  %3107 = vmatprep.subr.bf16.mxu1 %v3400_v40 }
 0x327   :  { %v810_v58 = vpack.c.bf16 %v807_v56, %v807_v56  ;;  %v785_v61 = vpack.c.bf16 %v782_v55, %v781_v52  ;;  %v783_v5 = vld [vmem:[#allocation2 + $0x20] sm:$0x3]  ;;  %v1037_v14 = vld [vmem:[#allocation2 + $0xa] sm:$0xff]  ;;  %v1038_v16 = vld [vmem:[#allocation2 + $0x12] sm:$0xff] }
 0x328   :  { %2733 = vmatmul.mubr.bf16.gmra.mrb[16].mxu0 %v809_v53  ;;  %v786_v8 = vpack.c.bf16 %v783_v5, %v783_v5  ;;  %v1041_v15 = vpack.c.bf16 %v1037_v14, %v1036_v13  ;;  %v1039_v17 = vld [vmem:[#allocation2 + $0x1a] sm:$0xff]  ;;  %v1040_v19 = vld [vmem:[#allocation2 + $0x22] sm:$0x3] }
 0x329   :  { %2745 = vmatpush3.bf16.msra.mxu0 %v3356_v51  ;;  %2736 = vmatprep.mubr.msk.bf16.mxu0 %vm3399_vm0, %v3398_v1  ;;  %v1042_v18 = vpack.c.bf16 %v1039_v17, %v1038_v16  ;;  %v1043_v20 = vpack.c.bf16 %v1040_v19, %v1040_v19  ;;  %v1240_v48 = vld [vmem:[%s4262_s7 + $0x78] sm:$0xff] }
 0x32a   :  { %2746 = vmatprep.subr.bf16.mxu0 %v3398_v1  ;;  %3109 = vmatpush3.bf16.msra.mxu1 %v3937_v42  ;;  %v3956_v0 = vpack.c.bf16 %v1240_v48, %v1239_v62 }
 0x32b   :  { %3110 = vmatprep.subr.bf16.mxu1 %v3400_v40 }
 0x32d   :  { %2747 = vmatpush3.bf16.msra.mxu0 %v3357_v54 }
 0x32e   :  { %2748 = vmatprep.subr.bf16.mxu0 %v3398_v1  ;;  %3112 = vmatpush3.bf16.msra.mxu1 %v3947_v47 }
 0x32f   :  { %3113 = vmatprep.subr.bf16.mxu1 %v3400_v40 }
 0x330   :  { %2737 = vmatmul.mubr.bf16.gmra.mrb[20].mxu0 %v810_v58 }
 0x331   :  { %2749 = vmatpush3.bf16.msra.mxu0 %v3358_v57  ;;  %2756 = vmatprep.mubr.msk.bf16.mxu0 %vm3399_vm0, %v3398_v1 }
 0x332   :  { %2750 = vmatprep.subr.bf16.mxu0 %v3398_v1  ;;  %3115 = vmatpush3.bf16.msra.mxu1 %v3956_v0 }
 0x333   :  { %3116 = vmatprep.subr.bf16.mxu1 %v3400_v40 }
 0x335   :  { %2751 = vmatpush3.bf16.msra.mxu0 %v3359_v60 }
 0x336   :  { %2752 = vmatprep.subr.bf16.mxu0 %v3398_v1 }
 0x339   :  { %2753 = vmatpush3.bf16.msra.mxu0 %v3360_v63 }
 0x33a   :  { %2754 = vmatprep.subr.bf16.mxu0 %v3398_v1 }
 0x33d   :  { %2755 = vmatpush3.bf16.msra.mxu0 %v3361_v2 }
 0x33e   :  { %2768 = vmatprep.subr.bf16.mxu0 %v3398_v1 }
 0x340   :  { %2757 = vmatmul.mubr.bf16.vlgmr.msra.gmra.mrb[12].mxu0 %v784_v46 }
 0x341   :  { %2769 = vmatpush3.bf16.msra.mxu0 %v3362_v43  ;;  %2760 = vmatprep.mubr.msk.bf16.mxu0 %vm3399_vm0, %v3398_v1 }
 0x342   :  { %2770 = vmatprep.subr.bf16.mxu0 %v3398_v1 }
 0x345   :  { %2771 = vmatpush3.bf16.msra.mxu0 %v3363_v49 }
 0x346   :  { %2772 = vmatprep.subr.bf16.mxu0 %v3398_v1 }
 0x348   :  { %2761 = vmatmul.mubr.bf16.gmra.mrb[16].mxu0 %v785_v61 }
 0x349   :  { %2773 = vmatpush3.bf16.msra.mxu0 %v3364_v59  ;;  %2764 = vmatprep.mubr.msk.bf16.mxu0 %vm3399_vm0, %v3398_v1 }
 0x34a   :  { %2774 = vmatprep.subr.bf16.mxu0 %v3398_v1 }
 0x34d   :  { %2775 = vmatpush3.bf16.msra.mxu0 %v3365_v4 }
 0x34e   :  { %2776 = vmatprep.subr.bf16.mxu0 %v3398_v1 }
 0x350   :  { %2765 = vmatmul.mubr.bf16.gmra.mrb[20].mxu0 %v786_v8 }
 0x351   :  { %2777 = vmatpush3.bf16.msra.mxu0 %v3366_v6  ;;  %2784 = vmatprep.mubr.msk.bf16.mxu0 %vm3399_vm0, %v3398_v1 }
 0x352   :  { %2778 = vmatprep.subr.bf16.mxu0 %v3398_v1 }
 0x355   :  { %2779 = vmatpush3.bf16.msra.mxu0 %v3367_v9 }
 0x356   :  { %2780 = vmatprep.subr.bf16.mxu0 %v3398_v1 }
 0x359   :  { %2781 = vmatpush3.bf16.msra.mxu0 %v3368_v11 }
 0x35a   :  { %2782 = vmatprep.subr.bf16.mxu0 %v3398_v1 }
 0x35d   :  { %2783 = vmatpush3.bf16.msra.mxu0 %v3369_v12 }
 0x360   :  { %2785 = vmatmul.mubr.bf16.vlgmr.msra.gmra.mrb[12].mxu0 %v1041_v15 }
 0x361   :  { %2788 = vmatprep.mubr.msk.bf16.mxu0 %vm3399_vm0, %v3398_v1 }
 0x368   :  { %2789 = vmatmul.mubr.bf16.gmra.mrb[16].mxu0 %v1042_v18 }
 0x369   :  { %2792 = vmatprep.mubr.msk.bf16.mxu0 %vm3399_vm0, %v3398_v1 }
 0x370   :  { %2793 = vmatmul.mubr.bf16.gmra.mrb[20].mxu0 %v1043_v20 }
 0x433   :  { %v3961_v7 = vpop.f32.mrb[12].mxu0 }
 0x434   :  { %v2786_v10 = vpop.f32.mrb[13].mxu0  ;;  %v1177_v50 = vmul.f32 %v3961_v7, %v3961_v7 }
 0x435   :  { %v3963_v22 = vpop.f32.mrb[14].mxu0 }
 0x436   :  { %v1170_v51 = vadd.f32 %v3963_v22, %v3961_v7  ;;  %v1178_v53 = vmul.f32 %v3963_v22, %v3963_v22  ;;  %v2787_v54 = vpop.f32.mrb[15].mxu0 }
 0x437   :  { %v1649_v54 = vld [vmem:[%s4267_s12 + $0x28] sm:$0xff] }
 0x438   :  { %v1179_v56 = vadd.f32 %v1178_v53, %v1177_v50  ;;  %v1171_v43 = vrot.slane %v1170_v51, 4 }
 0x43a   :  { %v1180_v52 = vrot.slane %v1179_v56, 4  ;;  %v1172_v61 = vadd.f32 %v1171_v43, %v1170_v51 }
 0x43b   :  { %v3971_v57 = vpop.f32.mrb[16].mxu0 }
 0x43c   :  { %v2790_v58 = vpop.f32.mrb[17].mxu0  ;;  %v1203_v60 = vmul.f32 %v3971_v57, %v3971_v57  ;;  %v1189_v2 = vrot.slane %v3971_v57, 2  ;;  %v1181_v11 = vadd.f32 %v1180_v52, %v1179_v56  ;;  %v1173_v16 = vrot.slane %v1172_v61, 2 }
 0x43d   :  { %v3975_v63 = vpop.f32.mrb[18].mxu0  ;;  %v1650_v58 = vld [vmem:[%s4267_s12 + $0x30] sm:$0xff] }
 0x43e   :  { %v1190_v3 = vrot.slane %v3975_v63, 2  ;;  %v2791_v39 = vpop.f32.mrb[19].mxu0  ;;  %v1204_v46 = vmul.f32 %v3975_v63, %v3975_v63  ;;  %v1209_v55 = vrot.slane %v1203_v60, 2  ;;  %v1182_v19 = vrot.slane %v1181_v11, 2  ;;  %v1651_v60 = vld [vmem:[%s4267_s12 + $0x38] sm:$0xff] }
 0x43f   :  { %v1174_v23 = vadd.f32 %v1173_v16, %v1172_v61  ;;  %v1653_v39 = vld [vmem:[%s4267_s12 + $0x48] sm:$0xff] }
 0x440   :  { %v1191_v49 = vsel %vm394_vm2, %v1189_v2, %v1190_v3  ;;  %v1210_v59 = vrot.slane %v1204_v46, 2  ;;  %v1183_v29 = vadd.f32 %v1182_v19, %v1181_v11  ;;  %v4049_v2 = vpack.c.bf16 %v1651_v60, %v1650_v58  ;;  %v1654_v46 = vld [vmem:[%s4267_s12 + $0x50] sm:$0xff]  ;;  %v1389_v19 = vld [vmem:[%s4265_s10] sm:$0x1] }
 0x441   :  { %v1175_v33 = vrot.slane %v1174_v23, 1 }
 0x442   :  { %v1211_v4 = vsel %vm394_vm2, %v1209_v55, %v1210_v59  ;;  %v1184_v41 = vrot.slane %v1183_v29, 1 }
 0x443   :  { %v3983_v5 = vpop.f32.mrb[20].mxu0  ;;  %v1176_v45 = vadd.f32 %v1175_v33, %v1174_v23  ;;  %v1559_v33 = vld [vmem:[%s4266_s11 + $0x30] sm:$0xff] }
 0x444   :  { %v1192_v6 = vrot.slane %v3983_v5, 2  ;;  %v1205_v8 = vmul.f32 %v3983_v5, %v3983_v5  ;;  %v2794_v9 = vpop.f32.mrb[21].mxu0  ;;  %v1185_v50 = vadd.f32 %v1184_v41, %v1183_v29  ;;  %v1557_v29 = vld [vmem:[%s4266_s11 + $0x20] sm:$0xff]  ;;  %v1562_v41 = vld [vmem:[%s4266_s11 + $0x48] sm:$0xff] }
 0x445   :  { %v1162_v12 = vpop.f32.mrb[22].mxu0 }
 0x446   :  { %v1193_v13 = vsel %vm394_vm2, %v1190_v3, %v1192_v6  ;;  %v1212_v14 = vrot.slane %v1205_v8, 2  ;;  %v2795_v15 = vpop.f32.mrb[23].mxu0  ;;  %v1652_v3 = vld [vmem:[%s4267_s12 + $0x40] sm:$0xff] }
 0x447   :  { %v1196_v17 = vadd.f32 %v1193_v13, %v1191_v49  ;;  %v4059_v43 = vpack.c.bf16 %v1653_v39, %v1652_v3  ;;  %v1655_v49 = vld [vmem:[%s4267_s12 + $0x58] sm:$0xff]  ;;  %v1385_v13 = vld [vmem:[%s4264_s9] sm:$0x1]  ;;  %v1554_v15 = vld [vmem:[%s4266_s11 + $0x8] sm:$0xff] }
 0x448   :  { %v1213_v18 = vsel %vm394_vm2, %v1210_v59, %v1212_v14  ;;  %v4069_v52 = vpack.c.bf16 %v1655_v49, %v1654_v46  ;;  %v1553_v14 = vld [vmem:[%s4266_s11] sm:$0xff] }
 0x449   :  { %v1197_v20 = vrot.slane %v1196_v17, 4  ;;  %v1216_v21 = vadd.f32 %v1213_v18, %v1211_v4  ;;  %v4083_v18 = vpack.c.bf16 %v1554_v15, %v1553_v14 }
 0x44b   :  { %v1198_v26 = vadd.f32 %v1197_v20, %v1196_v17  ;;  %v1217_v27 = vrot.slane %v1216_v21, 4  ;;  %v1555_v20 = vld [vmem:[%s4266_s11 + $0x10] sm:$0xff] }
 0x44d   :  { %v1199_v30 = vrot.slane %v1198_v26, 2  ;;  %v1218_v32 = vadd.f32 %v1217_v27, %v1216_v21  ;;  %v1556_v21 = vld [vmem:[%s4266_s11 + $0x18] sm:$0xff] }
 0x44e   :  { %v4098_v27 = vpack.c.bf16 %v1556_v21, %v1555_v20 }
 0x44f   :  { %v1200_v35 = vadd.f32 %v1199_v30, %v1198_v26  ;;  %v1219_v36 = vrot.slane %v1218_v32, 2  ;;  %v1558_v30 = vld [vmem:[%s4266_s11 + $0x28] sm:$0xff] }
 0x451   :  { %v1201_v38 = vrot.slane %v1200_v35, 1  ;;  %v1220_v44 = vadd.f32 %v1219_v36, %v1218_v32  ;;  %v4109_v32 = vpack.c.bf16 %v1558_v30, %v1557_v29 }
 0x453   :  { %v1202_v62 = vadd.f32 %v1201_v38, %v1200_v35  ;;  %v1221_v48 = vrot.slane %v1220_v44, 1  ;;  %v1560_v35 = vld [vmem:[%s4266_s11 + $0x38] sm:$0xff]  ;;  %v1561_v38 = vld [vmem:[%s4266_s11 + $0x40] sm:$0xff] }
 0x454   :  { %v4119_v36 = vpack.c.bf16 %v1560_v35, %v1559_v33 }
 0x455   :  { %v1223_v10 = vadd.f32 %v1202_v62, %v1176_v45  ;;  %v1222_v51 = vadd.f32 %v1221_v48, %v1220_v44  ;;  %v4129_v44 = vpack.c.bf16 %v1562_v41, %v1561_v38  ;;  %v1563_v45 = vld [vmem:[%s4266_s11 + $0x50] sm:$0xff]  ;;  %v1564_v62 = vld [vmem:[%s4266_s11 + $0x58] sm:$0xff] }
 0x456   :  { %v4140_v48 = vpack.c.bf16 %v1564_v62, %v1563_v45 }
 0x457   :  { %2829 = vmatmul.mubr.f32.vlgmr.msra.gmra.mrb[8].mxu1 %v1223_v10  ;;  %v1224_v53 = vadd.f32 %v1222_v51, %v1185_v50  ;;  %v1656_v10 = vld [vmem:[%s4267_s12 + $0x60] sm:$0xff]  ;;  %v1657_v50 = vld [vmem:[%s4267_s12 + $0x68] sm:$0xff] }
 0x458   :  { %3118 = vmatpush3.bf16.msra.mxu1 %v3887_v24  ;;  %2863 = vmatprep.mubr.msk.f32.mxu1 %vm3399_vm0, %v3398_v1  ;;  %v1392_v24 = vld [vmem:[%s4263_s8] sm:$0xff]  ;;  %v4150_v51 = vpack.c.bf16 %v1657_v50, %v1656_v10 }
 0x459   :  { %3119 = vmatprep.subr.bf16.mxu1 %v3400_v40 }
 0x45c   :  { %3121 = vmatpush3.bf16.msra.mxu1 %v3897_v28  ;;  %v1644_v28 = vld [vmem:[%s4267_s12] sm:$0xff] }
 0x45d   :  { %3122 = vmatprep.subr.bf16.mxu1 %v3400_v40 }
 0x460   :  { %3124 = vmatpush3.bf16.msra.mxu1 %v3907_v31  ;;  %v1645_v31 = vld [vmem:[%s4267_s12 + $0x8] sm:$0xff] }
 0x461   :  { %3125 = vmatprep.subr.bf16.mxu1 %v3400_v40 }
 0x464   :  { %3127 = vmatpush3.bf16.msra.mxu1 %v3917_v34  ;;  %v4020_v34 = vpack.c.bf16 %v1645_v31, %v1644_v28  ;;  %v1658_v31 = vld [vmem:[%s4267_s12 + $0x70] sm:$0xff] }
 0x465   :  { %3128 = vmatprep.subr.bf16.mxu1 %v3400_v40 }
 0x466   :  { %3173 = vmatprep.subr.bf16.mxu0 %v4020_v34 }
 0x467   :  { %3175 = vmatpush3.bf16.msra.mxu0 %v4020_v34 }
 0x468   :  { %3130 = vmatpush3.bf16.msra.mxu1 %v3927_v37  ;;  %v1646_v37 = vld [vmem:[%s4267_s12 + $0x10] sm:$0xff] }
 0x469   :  { %3131 = vmatprep.subr.bf16.mxu1 %v3400_v40 }
 0x46c   :  { %3133 = vmatpush3.bf16.msra.mxu1 %v3937_v42  ;;  %v1647_v42 = vld [vmem:[%s4267_s12 + $0x18] sm:$0xff] }
 0x46d   :  { %3134 = vmatprep.subr.bf16.mxu1 %v3400_v40 }
 0x470   :  { %3136 = vmatpush3.bf16.msra.mxu1 %v3947_v47  ;;  %v4028_v47 = vpack.c.bf16 %v1647_v42, %v1646_v37  ;;  %v1659_v37 = vld [vmem:[%s4267_s12 + $0x78] sm:$0xff]  ;;  %v1567_v42 = vld [vmem:[%s4266_s11 + $0x70] sm:$0xff] }
 0x471   :  { %3137 = vmatprep.subr.bf16.mxu1 %v3400_v40 }
 0x472   :  { %3177 = vmatprep.subr.bf16.mxu0 %v4028_v47 }
 0x473   :  { %3179 = vmatpush3.bf16.msra.mxu0 %v4028_v47 }
 0x474   :  { %3139 = vmatpush3.bf16.msra.mxu1 %v3956_v0  ;;  %v1648_v0 = vld [vmem:[%s4267_s12 + $0x20] sm:$0xff] }
 0x475   :  { %2866 = vmatprep.subr.mxu1 %v3398_v1  ;;  %v4039_v56 = vpack.c.bf16 %v1649_v54, %v1648_v0  ;;  %v3200_v0 = vpack.c.bf16 %v1659_v37, %v1658_v31  ;;  %v1568_v54 = vld [vmem:[%s4266_s11 + $0x78] sm:$0xff] }
 0x476   :  { %v4176_v58 = vpack.c.bf16 %v1568_v54, %v1567_v42 }
 0x477   :  { %2864 = vmatmul.mubr.f32.vlgmr.msra.gmra.mrb[10].mxu1 %v1224_v53  ;;  %3181 = vmatprep.subr.bf16.mxu0 %v4039_v56  ;;  %v1565_v53 = vld [vmem:[%s4266_s11 + $0x60] sm:$0xff] }
 0x478   :  { %2868 = vmatprep.mubr.msk.f32.mxu1 %vm3399_vm0, %v3398_v1  ;;  %2867 = vmatpush3.msra.mxu1 %v1392_v24 }
 0x479   :  { %2871 = vmatprep.subr.mxu1 %v3398_v1  ;;  %3183 = vmatpush3.bf16.msra.mxu0 %v4039_v56 }
 0x47a   :  { %3185 = vmatprep.subr.bf16.mxu0 %v4049_v2 }
 0x47d   :  { %3187 = vmatpush3.bf16.msra.mxu0 %v4049_v2 }
 0x47e   :  { %3189 = vmatprep.subr.bf16.mxu0 %v4059_v43 }
 0x481   :  { %3191 = vmatpush3.bf16.msra.mxu0 %v4059_v43 }
 0x482   :  { %3193 = vmatprep.subr.bf16.mxu0 %v4069_v52 }
 0x485   :  { %3195 = vmatpush3.bf16.msra.mxu0 %v4069_v52 }
 0x486   :  { %3197 = vmatprep.subr.bf16.mxu0 %v4150_v51 }
 0x489   :  { %3199 = vmatpush3.bf16.msra.mxu0 %v4150_v51 }
 0x48a   :  { %3201 = vmatprep.subr.bf16.mxu0 %v3200_v0 }
 0x48d   :  { %3203 = vmatpush3.bf16.msra.mxu0 %v3200_v0 }
 0x48e   :  { %3243 = vmatprep.subr.bf16.mxu0 %v4020_v34 }
 0x52a   :  { %v1307_v55 = vpop.f32.mrb[8].mxu1 }
 0x52b   :  { %v2830_v59 = vpop.f32.mrb[9].mxu1  ;;  %v1311_v61 = vmul.f32 0.001953125, %v1307_v55 }
 0x52d   :  { %v1383_v6 = vmul.f32 %v1311_v61, %v1311_v61 }
 0x54a   :  { %v1378_v4 = vpop.f32.mrb[10].mxu1 }
 0x54b   :  { %v1382_v8 = vmul.f32 0.001953125, %v1378_v4  ;;  %v2865_v9 = vpop.f32.mrb[11].mxu1 }
 0x54d   :  { %v1384_v11 = vsub.f32 %v1382_v8, %v1383_v6 }
 0x54f   :  { %v1386_v12 = vadd.f32 1e-05, %v1384_v11 }
 0x551   :  { %3372 = vrsqrt.f32 %v1386_v12 }
 0x55b   :  { %v3373_v16 = vpop.eup %3372 }
 0x55c   :  { %v1388_v17 = vmul.f32 %v3373_v16, %v1385_v13 }
 0x55e   :  { %2869 = vmatmul.mubr.msk.f32.vlgmr.msra.gmra.mrb[12].mxu1 %vm599_vm3, %v1388_v17  ;;  %v1390_v23 = vmul.f32 %v1388_v17, %v1311_v61 }
 0x55f   :  { %2872 = vmatpush3.msra.mxu1 %v1392_v24  ;;  %2873 = vmatprep.mubr.msk.f32.mxu1 %vm3399_vm0, %v3398_v1  ;;  %v1566_v24 = vld [vmem:[%s4266_s11 + $0x68] sm:$0xff] }
 0x560   :  { %v1391_v26 = vsub.f32 %v1389_v19, %v1390_v23  ;;  %3141 = vmatprep.subr.bf16.mxu1 %v4083_v18  ;;  %v4158_v28 = vpack.c.bf16 %v1566_v24, %v1565_v53 }
 0x562   :  { %2874 = vmatmul.mubr.msk.f32.vlgmr.msra.gmra.mrb[14].mxu1 %vm599_vm3, %v1391_v26 }
 0x563   :  { %3143 = vmatpush3.bf16.msra.mxu1 %v4083_v18 }
 0x564   :  { %3145 = vmatprep.subr.bf16.mxu1 %v4098_v27 }
 0x567   :  { %3147 = vmatpush3.bf16.msra.mxu1 %v4098_v27 }
 0x568   :  { %3149 = vmatprep.subr.bf16.mxu1 %v4109_v32 }
 0x56b   :  { %3151 = vmatpush3.bf16.msra.mxu1 %v4109_v32 }
 0x56c   :  { %3153 = vmatprep.subr.bf16.mxu1 %v4119_v36 }
 0x56f   :  { %3155 = vmatpush3.bf16.msra.mxu1 %v4119_v36 }
 0x570   :  { %3157 = vmatprep.subr.bf16.mxu1 %v4129_v44 }
 0x573   :  { %3159 = vmatpush3.bf16.msra.mxu1 %v4129_v44 }
 0x574   :  { %3161 = vmatprep.subr.bf16.mxu1 %v4140_v48 }
 0x577   :  { %3163 = vmatpush3.bf16.msra.mxu1 %v4140_v48 }
 0x578   :  { %3165 = vmatprep.subr.bf16.mxu1 %v4158_v28 }
 0x57b   :  { %3167 = vmatpush3.bf16.msra.mxu1 %v4158_v28 }
 0x57c   :  { %3169 = vmatprep.subr.bf16.mxu1 %v4176_v58 }
 0x57f   :  { %3171 = vmatpush3.bf16.msra.mxu1 %v4176_v58 }
 0x580   :  { %3204 = vmatprep.subr.bf16.mxu1 %v3400_v40 }
 0x631   :  { %v1462_v60 = vpop.f32.mrb[12].mxu1 }
 0x632   :  { %v1542_v3 = vrot.slane %v1462_v60, %v3793_v25  ;;  %v2870_v39 = vpop.f32.mrb[13].mxu1 }
 0x634   :  { %v1543_v46 = vmul.f32 %v1542_v3, %v3961_v7  ;;  %v1544_v49 = vmul.f32 %v1542_v3, %v3963_v22  ;;  %v1888_v55 = vmul.f32 %v1542_v3, %v3971_v57  ;;  %v1889_v59 = vmul.f32 %v1542_v3, %v3975_v63 }
 0x635   :  { %v1535_v61 = vpop.f32.mrb[14].mxu1  ;;  %v1890_v4 = vmul.f32 %v1542_v3, %v3983_v5 }
 0x636   :  { %v1548_v6 = vrot.slane %v1535_v61, %v3793_v25  ;;  %v2875_v8 = vpop.f32.mrb[15].mxu1 }
 0x638   :  { %v1549_v9 = vadd.f32 %v1548_v6, %v1543_v46  ;;  %v1550_v11 = vadd.f32 %v1548_v6, %v1544_v49  ;;  %v1891_v12 = vadd.f32 %v1888_v55, %v1548_v6  ;;  %v1892_v13 = vadd.f32 %v1889_v59, %v1548_v6 }
 0x639   :  { %v1893_v14 = vadd.f32 %v1890_v4, %v1548_v6 }
 0x63a   :  { %v1551_v15 = vmax.f32 %v1549_v9, 0.0  ;;  %v1552_v16 = vmax.f32 %v1550_v11, 0.0  ;;  %v1894_v7 = vmax.f32 %v1891_v12, 0.0  ;;  %v1895_v17 = vmax.f32 %v1892_v13, 0.0 }
 0x63b   :  { %v1896_v22 = vmax.f32 %v1893_v14, 0.0 }
 0x63c   :  { %2908 = vmatprep.mubr.f32.mxu1 %v1551_v15  ;;  %2943 = vmatprep.mubr.f32.mxu0 %v1551_v15  ;;  %v1916_v57 = vrot.slane %v1894_v7, 2  ;;  %v1917_v63 = vrot.slane %v1895_v17, 2 }
 0x63d   :  { %2909 = vmatmul.mubr.f32.vlgmr.msra.gmra.mrb[16].mxu1 %v1552_v16  ;;  %2944 = vmatmul.mubr.f32.vlgmr.msra.gmra.mrb[24].mxu0 %v1552_v16  ;;  %v1919_v5 = vrot.slane %v1896_v22, 2 }
 0x63e   :  { %3245 = vmatpush3.bf16.msra.mxu0 %v4020_v34  ;;  %v1918_v25 = vsel %vm394_vm2, %v1916_v57, %v1917_v63  ;;  %2950 = vmatprep.mubr.msk.f32.mxu1 %vm3399_vm0, %v3398_v1 }
 0x63f   :  { %3027 = vmatprep.mubr.f32.mxu0 %v1918_v25  ;;  %3247 = vmatprep.subr.bf16.mxu0 %v4028_v47  ;;  %v1920_v19 = vsel %vm394_vm2, %v1917_v63, %v1919_v5 }
 0x642   :  { %3249 = vmatpush3.bf16.msra.mxu0 %v4028_v47 }
 0x643   :  { %3251 = vmatprep.subr.bf16.mxu0 %v4039_v56 }
 0x646   :  { %3253 = vmatpush3.bf16.msra.mxu0 %v4039_v56 }
 0x647   :  { %3255 = vmatprep.subr.bf16.mxu0 %v4049_v2 }
 0x64a   :  { %3257 = vmatpush3.bf16.msra.mxu0 %v4049_v2 }
 0x64b   :  { %3259 = vmatprep.subr.bf16.mxu0 %v4059_v43 }
 0x64e   :  { %3261 = vmatpush3.bf16.msra.mxu0 %v4059_v43  ;;  %v1737_v43 = vld [vmem:[%s4268_s13] sm:$0xff]  ;;  %s3401_s13 = smov [#allocation3]  }
 0x64f   :  { %3263 = vmatprep.subr.bf16.mxu0 %v4069_v52 }
 0x652   :  { %3265 = vmatpush3.bf16.msra.mxu0 %v4069_v52  ;;  %v1812_v52 = vld [vmem:[%s4269_s14] sm:$0xff]  ;;  %s2246_s14 = sshll.u32 %s3401_s13, 4  ;;  %s2247_s14 = int_to_ptr.vmem [resolvable:$true] %s2246_s14 }
 0x653   :  { %3267 = vmatprep.subr.bf16.mxu0 %v4150_v51  ;;  %s3374_s1 = scalar_lea.vmem %s2247_s14, 256  ;;  %p3379_p1 = scmp.lt.s32.totalorder %s2247_s14, %s2247_s14 }
 0x654   :  { %p3375_p0 = scmp.ne.s32.totalorder %s2247_s14, %s3374_s1  ;;  %p3380_p2 = scmp.lt.s32.totalorder %s3374_s1, %s3374_s1 }
 0x656   :  { %3269 = vmatpush3.bf16.msra.mxu0 %v4150_v51  ;;  %p3381_p3 = por %p3380_p2, %p3379_p1 }
 0x657   :  { %3271 = vmatprep.subr.bf16.mxu0 %v3200_v0 }
 0x658   :  { %p3382_p4 = pnand %p3381_p3, %p3375_p0 }
 0x65a   :  { %3273 = vmatpush3.bf16.msra.mxu0 %v3200_v0 }
 0x65d   :  { %3028 = vmatmul.mubr.f32.vlgmr.msra.gmra.mrb[26].mxu0 %v1920_v19 }
 0x710   :  { %v2910_v34 = vpop.f32.mrb[16].mxu1  ;;  %v2945_v47 = vpop.f32.mrb[24].mxu0 }
 0x711   :  { %v1736_v56 = vmax.f32 %v2910_v34, %v2945_v47  ;;  %v1635_v20 = vpop.f32.mrb[17].mxu1  ;;  %v1726_v2 = vpop.f32.mrb[25].mxu0 }
 0x712   :  { %v1735_v21 = vmax.f32 %v1635_v20, %v1726_v2 }
 0x714   :  { %v3205_v23 = vpack.c.bf16 %v1736_v56, %v1735_v21 }
 0x716   :  { %3206 = vmatpush3.bf16.msra.mxu1 %v3205_v23 }
 0x717   :  { %3207 = vmatprep.subr.bf16.mxu1 %v3400_v40 }
 0x719   :  { %2951 = vmatmul.mubr.msk.f32.vlgmr.msra.gmra.mrb[18].mxu1 %vm1738_vm4, %v1737_v43 }
 0x71a   :  { %3209 = vmatpush3.bf16.msra.mxu1 %v3205_v23  ;;  %2957 = vmatprep.mubr.msk.f32.mxu1 %vm3399_vm0, %v3398_v1 }
 0x71b   :  { %3211 = vmatprep.subr.bf16.mxu1 %v4083_v18 }
 0x71d   :  { %2958 = vmatmul.mubr.msk.f32.vlgmr.msra.gmra.mrb[20].mxu1 %vm1738_vm4, %v1812_v52 }
 0x71e   :  { %3213 = vmatpush3.bf16.msra.mxu1 %v4083_v18  ;;  %2992 = vmatprep.mubr.f32.mxu1 %v1918_v25 }
 0x71f   :  { %3215 = vmatprep.subr.bf16.mxu1 %v4098_v27 }
 0x722   :  { %3217 = vmatpush3.bf16.msra.mxu1 %v4098_v27 }
 0x723   :  { %3219 = vmatprep.subr.bf16.mxu1 %v4109_v32 }
 0x726   :  { %3221 = vmatpush3.bf16.msra.mxu1 %v4109_v32 }
 0x727   :  { %3223 = vmatprep.subr.bf16.mxu1 %v4119_v36 }
 0x72a   :  { %3225 = vmatpush3.bf16.msra.mxu1 %v4119_v36 }
 0x72b   :  { %3227 = vmatprep.subr.bf16.mxu1 %v4129_v44 }
 0x72e   :  { %3229 = vmatpush3.bf16.msra.mxu1 %v4129_v44 }
 0x72f   :  { %3231 = vmatprep.subr.bf16.mxu1 %v4140_v48 }
 0x730   :  { %v3029_v18 = vpop.f32.mrb[26].mxu0 }
 0x731   :  { %v2080_v26 = vpop.f32.mrb[27].mxu0 }
 0x732   :  { %3233 = vmatpush3.bf16.msra.mxu1 %v4140_v48 }
 0x733   :  { %3235 = vmatprep.subr.bf16.mxu1 %v4158_v28 }
 0x736   :  { %3237 = vmatpush3.bf16.msra.mxu1 %v4158_v28 }
 0x737   :  { %3239 = vmatprep.subr.bf16.mxu1 %v4176_v58 }
 0x73a   :  { %3241 = vmatpush3.bf16.msra.mxu1 %v4176_v58 }
 0x73b   :  { %3274 = vmatprep.subr.bf16.mxu1 %v3400_v40 }
 0x73d   :  { %2993 = vmatmul.mubr.f32.vlgmr.msra.gmra.mrb[22].mxu1 %v1920_v19 }
 0x73e   :  { %3034 = vmatprep.mubr.msk.f32.mxu1 %vm3399_vm0, %v3398_v1 }
 0x7ec   :  { %v1808_v27 = vpop.f32.mrb[18].mxu1 }
 0x7ed   :  { %v2952_v29 = vpop.f32.mrb[19].mxu1 }
 0x7f0   :  { %v1882_v30 = vpop.f32.mrb[20].mxu1 }
 0x7f1   :  { %v1886_v32 = vmax.f32 %v1808_v27, %v1882_v30  ;;  %v2959_v33 = vpop.f32.mrb[21].mxu1 }
 0x7f3   :  { %1887 = vst.msk [vmem:[#allocation3] sm:$0xff] %vm109_vm1, %v1886_v32 }
 0x810   :  { %v2994_v35 = vpop.f32.mrb[22].mxu1 }
 0x811   :  { %v2090_v36 = vmax.f32 %v2994_v35, %v3029_v18  ;;  %v1989_v38 = vpop.f32.mrb[23].mxu1 }
 0x812   :  { %v2089_v41 = vmax.f32 %v1989_v38, %v2080_v26 }
 0x814   :  { %v3275_v44 = vpack.c.bf16 %v2090_v36, %v2089_v41 }
 0x816   :  { %3276 = vmatpush3.bf16.msra.mxu1 %v3275_v44 }
 0x817   :  { %3277 = vmatprep.subr.bf16.mxu1 %v3400_v40 }
 0x819   :  { %3035 = vmatmul.mubr.msk.f32.vlgmr.msra.gmra.mrb[24].mxu1 %vm1738_vm4, %v1737_v43 }
 0x81a   :  { %3279 = vmatpush3.bf16.msra.mxu1 %v3275_v44  ;;  %3041 = vmatprep.mubr.msk.f32.mxu1 %vm3399_vm0, %v3398_v1 }
 0x81d   :  { %3042 = vmatmul.mubr.msk.f32.vlgmr.msra.gmra.mrb[26].mxu1 %vm1738_vm4, %v1812_v52 }
 0x8ec   :  { %v2161_v45 = vpop.f32.mrb[24].mxu1 }
 0x8ed   :  { %v3036_v62 = vpop.f32.mrb[25].mxu1 }
 0x8f0   :  { %v2235_v48 = vpop.f32.mrb[26].mxu1 }
 0x8f1   :  { %v2239_v10 = vmax.f32 %v2161_v45, %v2235_v48  ;;  %v3043_v50 = vpop.f32.mrb[27].mxu1 }
 0x8f3   :  { %2240 = vst.msk [vmem:[#allocation3 + $0x8] sm:$0xff] %vm109_vm1, %v2239_v10 }
 0x8f4   :  { %3385 = shalt.err (!%p3382_p4)
}
 0x8f5   :  { %s3386_s23 = scalar_lea.hbm %s4270_s15, 256 }
 0x8f6   :  { %p3387_p5 = scmp.ne.s32.totalorder %s4270_s15, %s3386_s23  ;;  %p3390_p6 = scmp.lt.u32.totalorder %s3386_s23, %s4270_s15 }
 0x8f8   :  { %p3392_p7 = pnand %p3390_p6, %p3387_p5 }
 0x8fa   :  { %3395 = shalt.err (!%p3392_p7)
}
 0x8fb   :  { %s3402_s26 = smov 128   ;;  %s3403_s27 = smov 8  }
 0x8fc   :  { %2252 = dma.vmem_to_hbm [thread:$0]  %s2247_s14, 256, %s4270_s15, [#allocation4], %s3402_s26, %s3402_s26, %s3403_s27  }
 0x8fd   :  { %3396 = dma.done.wait [#allocation4], 256  }
 0x8fe   :  { %3397 = vsyncadd [#allocation4], 4294967040 }
 0x8ff   :  { %2256 = vsyncpa [#allocation4], 1 }

</bundles_post_ra>
